<compile_context>
chip_gen: v7x
topology: tpu7x:2x2x1
jax: 0.10.0
libtpu: 0.0.40
codegen_flags: <defaults>
</compile_context>

<pallas_src>
import functools

import jax
import jax.numpy as jnp
from jax.experimental import pallas as pl
from jax.experimental.pallas import tpu as pltpu


# ----------------------------------------------------------------------------
# In-kernel helpers
# ----------------------------------------------------------------------------
def _build_reflect_pad(x_ref, xp_ref, *, T_in, pad, loff):
    """Copy this batch element into a VMEM scratch with reflect padding.

    Scratch row (loff - pad + q) holds padded-time index q, so the bulk copy
    lands sublane-aligned at row `loff` (loff is a multiple of 8).
    """
    xp_ref[pl.ds(loff, T_in), :] = x_ref[0]
    for i in range(pad):
        # left reflect : padded index i            <- original index (pad - i)
        xp_ref[pl.ds(loff - pad + i, 1), :] = xp_ref[pl.ds(loff + pad - i, 1), :]
        # right reflect: padded index pad+T_in+i   <- original index (T_in-2-i)
        xp_ref[pl.ds(loff + T_in + i, 1), :] = xp_ref[pl.ds(loff + T_in - 2 - i, 1), :]


def _read_tap(x_ref, xp_ref, k, *, T_out, stride, pad, loff):
    """Read conv tap k as a (T_out, Cin) slab (strided along time)."""
    if pad == 0 and stride == 1:
        return x_ref[0]                                   # K == 1 fast path
    start = loff - pad + k
    idx = pl.ds(start, T_out) if stride == 1 else pl.ds(start, T_out, stride)
    return xp_ref[idx, :]


def _accumulate_bn_stats(stats_ref, z):
    """Accumulate per-channel [sum ; sum-of-squares] across batch grid steps."""
    @pl.when(pl.program_id(0) == 0)
    def _():
        stats_ref[...] = jnp.zeros_like(stats_ref)
    stats_ref[...] = stats_ref[...] + jnp.concatenate(
        [jnp.sum(z, axis=0, keepdims=True),
         jnp.sum(z * z, axis=0, keepdims=True)], axis=0)


# ----------------------------------------------------------------------------
# Pallas kernels
# ----------------------------------------------------------------------------
def _dwsep_bn_stats_kernel(x_ref, wdw_ref, bdw_ref, wpw_ref, bpw_ref,
                           z_ref, stats_ref, *scratch,
                           K, stride, T_in, T_out, pad, loff, matmul_dtype):
    """Depthwise(stride) + pointwise(1x1) conv, raw output + BN statistics."""
    xp_ref = scratch[0] if scratch else None
    if pad > 0:
        _build_reflect_pad(x_ref, xp_ref, T_in=T_in, pad=pad, loff=loff)

    wdw = wdw_ref[...]                                    # (K, Cin), f32
    acc = _read_tap(x_ref, xp_ref, 0, T_out=T_out, stride=stride,
                    pad=pad, loff=loff) * wdw[0:1, :]
    for k in range(1, K):
        acc = acc + _read_tap(x_ref, xp_ref, k, T_out=T_out, stride=stride,
                              pad=pad, loff=loff) * wdw[k:k + 1, :]
    acc = acc + bdw_ref[...]                              # depthwise bias

    z = jnp.dot(acc.astype(matmul_dtype), wpw_ref[...].astype(matmul_dtype),
                preferred_element_type=jnp.float32)       # 1x1 conv on the MXU
    z = z + bpw_ref[...]

    z_ref[0] = z.astype(z_ref.dtype)
    _accumulate_bn_stats(stats_ref, z)


def _conv1d_bn_stats_kernel(x_ref, w_ref, b_ref, z_ref, stats_ref, *scratch,
                            K, stride, T_in, T_out, pad, loff, matmul_dtype):
    """Full Conv1d (residual path): K taps folded into one MXU contraction."""
    xp_ref = scratch[0] if scratch else None
    if pad > 0:
        _build_reflect_pad(x_ref, xp_ref, T_in=T_in, pad=pad, loff=loff)

    taps = [_read_tap(x_ref, xp_ref, k, T_out=T_out, stride=stride,
                      pad=pad, loff=loff) for k in range(K)]
    xin = taps[0] if K == 1 else jnp.concatenate(taps, axis=1)   # (T_out, K*Cin)
    z = jnp.dot(xin.astype(matmul_dtype), w_ref[...].astype(matmul_dtype),
                preferred_element_type=jnp.float32)
    z = z + b_ref[...]

    z_ref[0] = z.astype(z_ref.dtype)
    _accumulate_bn_stats(stats_ref, z)


def _se_residual_swish_kernel(zse_ref, sc_ref, sh_ref, w1_ref, b1_ref,
                              w2_ref, b2_ref, *rest, beta, has_residual):
    """Fused: sigmoid(BN) -> avg-pool -> bottleneck -> rescale (+res) -> Swish."""
    if has_residual:
        zr_ref, scr_ref, shr_ref, out_ref = rest
    else:
        (out_ref,) = rest

    # y = sigmoid(BN(se-conv output)) for this batch element: (T, C)
    y = jax.nn.sigmoid(zse_ref[0] * sc_ref[...] + sh_ref[...])
    # Squeeze: AdaptivePool(1) over time; Excitation: two tiny FC + sigmoid.
    avg = jnp.mean(y, axis=0, keepdims=True)              # (1, C)
    h = jax.nn.sigmoid(jnp.dot(avg, w1_ref[...],
                               preferred_element_type=jnp.float32) + b1_ref[...])
    ctx = jax.nn.sigmoid(jnp.dot(h, w2_ref[...],
                                 preferred_element_type=jnp.float32) + b2_ref[...])
    o = y * ctx                                           # context repeated over T
    if has_residual:
        o = o + (zr_ref[0] * scr_ref[...] + shr_ref[...])  # BN(res-conv), fused
    out_ref[0] = (o * jax.nn.sigmoid(beta * o)).astype(out_ref.dtype)  # Swish


# ----------------------------------------------------------------------------
# pallas_call wrappers
# ----------------------------------------------------------------------------
def _param_spec(shape):
    zeros = (0,) * len(shape)
    return pl.BlockSpec(shape, lambda b: zeros)


def dwsep_conv_bn_stats(x, wdw, bdw, wpw, bpw, *, K, stride,
                        matmul_dtype=jnp.bfloat16):
    B, T_in, Cin = x.shape
    Cout = wpw.shape[1]
    pad = K // 2
    loff = ((pad + 7) // 8) * 8 if pad > 0 else 0
    T_out = (T_in - 1) // stride + 1
    scratch = ([pltpu.VMEM((loff + T_in + pad, Cin), x.dtype)] if pad > 0 else [])
    kernel = functools.partial(_dwsep_bn_stats_kernel, K=K, stride=stride,
                               T_in=T_in, T_out=T_out, pad=pad, loff=loff,
                               matmul_dtype=matmul_dtype)
    z, stats = pl.pallas_call(
        kernel,
        grid=(B,),
        in_specs=[
            pl.BlockSpec((1, T_in, Cin), lambda b: (b, 0, 0)),
            _param_spec((K, Cin)),
            _param_spec((1, Cin)),
            _param_spec((Cin, Cout)),
            _param_spec((1, Cout)),
        ],
        out_specs=(
            pl.BlockSpec((1, T_out, Cout), lambda b: (b, 0, 0)),
            _param_spec((2, Cout)),
        ),
        out_shape=(
            jax.ShapeDtypeStruct((B, T_out, Cout), x.dtype),
            jax.ShapeDtypeStruct((2, Cout), jnp.float32),
        ),
        scratch_shapes=scratch,
        # batch axis is a reduction axis for the BN-stats accumulator.
        compiler_params=pltpu.CompilerParams(dimension_semantics=("arbitrary",)),
    )(x, wdw, bdw, wpw, bpw)
    return z, stats


def conv1d_bn_stats(x, w2d, b, *, K, stride, matmul_dtype=jnp.bfloat16):
    B, T_in, Cin = x.shape
    Cout = w2d.shape[1]
    pad = K // 2
    loff = ((pad + 7) // 8) * 8 if pad > 0 else 0
    T_out = (T_in - 1) // stride + 1
    scratch = ([pltpu.VMEM((loff + T_in + pad, Cin), x.dtype)] if pad > 0 else [])
    kernel = functools.partial(_conv1d_bn_stats_kernel, K=K, stride=stride,
                               T_in=T_in, T_out=T_out, pad=pad, loff=loff,
                               matmul_dtype=matmul_dtype)
    z, stats = pl.pallas_call(
        kernel,
        grid=(B,),
        in_specs=[
            pl.BlockSpec((1, T_in, Cin), lambda b: (b, 0, 0)),
            _param_spec((K * Cin, Cout)),
            _param_spec((1, Cout)),
        ],
        out_specs=(
            pl.BlockSpec((1, T_out, Cout), lambda b: (b, 0, 0)),
            _param_spec((2, Cout)),
        ),
        out_shape=(
            jax.ShapeDtypeStruct((B, T_out, Cout), x.dtype),
            jax.ShapeDtypeStruct((2, Cout), jnp.float32),
        ),
        scratch_shapes=scratch,
        compiler_params=pltpu.CompilerParams(dimension_semantics=("arbitrary",)),
    )(x, w2d, b)
    return z, stats


def se_residual_swish(z_se, scale_se, shift_se, w1, b1, w2, b2, res_args,
                      *, beta):
    B, T, C = z_se.shape
    inner = w1.shape[1]
    has_res = res_args is not None

    inputs = [z_se, scale_se, shift_se, w1, b1, w2, b2]
    in_specs = [
        pl.BlockSpec((1, T, C), lambda b: (b, 0, 0)),
        _param_spec((1, C)),
        _param_spec((1, C)),
        _param_spec((C, inner)),
        _param_spec((1, inner)),
        _param_spec((inner, C)),
        _param_spec((1, C)),
    ]
    if has_res:
        z_r, scale_r, shift_r = res_args
        inputs += [z_r, scale_r, shift_r]
        in_specs += [
            pl.BlockSpec((1, T, C), lambda b: (b, 0, 0)),
            _param_spec((1, C)),
            _param_spec((1, C)),
        ]

    out = pl.pallas_call(
        functools.partial(_se_residual_swish_kernel, beta=beta,
                          has_residual=has_res),
        grid=(B,),
        in_specs=in_specs,
        out_specs=pl.BlockSpec((1, T, C), lambda b: (b, 0, 0)),
        out_shape=jax.ShapeDtypeStruct((B, T, C), z_se.dtype),
        compiler_params=pltpu.CompilerParams(dimension_semantics=("parallel",)),
    )(*inputs)
    return out


# ----------------------------------------------------------------------------
# Tiny glue ops (per-channel, negligible cost)
# ----------------------------------------------------------------------------
def _bn_scale_shift(stats, count, gamma, beta, eps):
    """BatchNorm (training-mode batch stats) -> per-channel affine."""
    mean = stats[0:1, :] / count
    var = stats[1:2, :] / count - mean * mean
    var = jnp.maximum(var, 0.0)            # guard E[x^2]-mean^2 cancellation
    scale = gamma * jax.lax.rsqrt(var + eps)
    shift = beta - mean * scale
    return scale, shift


def _fold_affine_into_depthwise(wdw, bdw, scale, shift):
    """depthwise(scale*x + shift) == depthwise_{w*scale}(x) + shift*sum_k w."""
    w_eff = wdw * scale
    b_eff = bdw + shift * jnp.sum(wdw, axis=0, keepdims=True)
    return w_eff, b_eff


# ----------------------------------------------------------------------------
# ContextNetBlock forward
# ----------------------------------------------------------------------------
def contextnet_block(x, params, *, num_layers, kernel_size, stride,
                     beta=1.0, eps=1e-5, residual=True,
                     matmul_dtype=jnp.bfloat16):
    h = x
    scale = shift = None
    for i in range(num_layers):
        s = stride if i == num_layers - 1 else 1
        lp = params["convs"][i]
        if scale is None:                          # first layer: raw input
            w_eff, b_eff = lp["wdw"], lp["bdw"]
        else:                                      # fold previous BN affine
            w_eff, b_eff = _fold_affine_into_depthwise(lp["wdw"], lp["bdw"],
                                                       scale, shift)
        h, stats = dwsep_conv_bn_stats(h, w_eff, b_eff, lp["wpw"], lp["bpw"],
                                       K=kernel_size, stride=s,
                                       matmul_dtype=matmul_dtype)
        scale, shift = _bn_scale_shift(stats, h.shape[0] * h.shape[1],
                                       lp["gamma"], lp["beta"], eps)

    # SE conv: DepthwiseSeparableConv1d(k=1) + BN (+ sigmoid fused downstream)
    sp = params["se"]
    w_eff, b_eff = _fold_affine_into_depthwise(sp["wdw"], sp["bdw"], scale, shift)
    z_se, stats_se = dwsep_conv_bn_stats(h, w_eff, b_eff, sp["wpw"], sp["bpw"],
                                         K=1, stride=1,
                                         matmul_dtype=matmul_dtype)
    scale_se, shift_se = _bn_scale_shift(stats_se,
                                         z_se.shape[0] * z_se.shape[1],
                                         sp["gamma"], sp["beta"], eps)

    res_args = None
    if residual:
        rp = params["res"]
        Kr, Cin_r, Cout_r = rp["w"].shape
        w2d = rp["w"].reshape(Kr * Cin_r, Cout_r)          # taps folded in glue
        z_r, stats_r = conv1d_bn_stats(x, w2d, rp["b"], K=Kr, stride=stride,
                                       matmul_dtype=matmul_dtype)
        scale_r, shift_r = _bn_scale_shift(stats_r,
                                           z_r.shape[0] * z_r.shape[1],
                                           rp["gamma"], rp["beta"], eps)
        res_args = (z_r, scale_r, shift_r)

    out = se_residual_swish(z_se, scale_se, shift_se, sp["w1"], sp["b1"],
                            sp["w2"], sp["b2"], res_args, beta=beta)
    # TODO(synk): Dropout(0.15) is identity in eval mode.
    return out


# ----------------------------------------------------------------------------
# Deterministic parameter initialization (kaiming-normal for dim>1 params)
# ----------------------------------------------------------------------------
def init_params(key, C_in, C_out, K, num_layers, inner_dim):
    keys = iter(jax.random.split(key, 64))

    def kaiming(k, shape, fan_in):
        return (jax.random.normal(k, shape, jnp.float32)
                * jnp.sqrt(2.0 / fan_in)).astype(jnp.float32)

    convs = []
    cin = C_in
    for _ in range(num_layers):
        convs.append(dict(
            wdw=kaiming(next(keys), (K, cin), K),
            bdw=jnp.zeros((1, cin), jnp.float32),
            wpw=kaiming(next(keys), (cin, C_out), cin),
            bpw=jnp.zeros((1, C_out), jnp.float32),
            gamma=jnp.ones((1, C_out), jnp.float32),
            beta=jnp.zeros((1, C_out), jnp.float32),
        ))
        cin = C_out
    se = dict(
        wdw=kaiming(next(keys), (1, C_out), 1),
        bdw=jnp.zeros((1, C_out), jnp.float32),
        wpw=kaiming(next(keys), (C_out, C_out), C_out),
        bpw=jnp.zeros((1, C_out), jnp.float32),
        gamma=jnp.ones((1, C_out), jnp.float32),
        beta=jnp.zeros((1, C_out), jnp.float32),
        w1=kaiming(next(keys), (C_out, inner_dim), C_out),
        b1=jnp.zeros((1, inner_dim), jnp.float32),
        w2=kaiming(next(keys), (inner_dim, C_out), inner_dim),
        b2=jnp.zeros((1, C_out), jnp.float32),
    )
    res = dict(
        w=kaiming(next(keys), (3, C_in, C_out), 3 * C_in),
        b=jnp.zeros((1, C_out), jnp.float32),
        gamma=jnp.ones((1, C_out), jnp.float32),
        beta=jnp.zeros((1, C_out), jnp.float32),
    )
    return dict(convs=convs, se=se, res=res)


# ----------------------------------------------------------------------------
if __name__ == "__main__":
    key = jax.random.PRNGKey(0)
    kx, kp = jax.random.split(key)

    # Small shapes consistent with ContextNetBlock: input (B, T, C_in)
    B, T, C_in = 2, 16, 8
    C_out, kernel_size, num_layers, inner_dim, stride = 16, 3, 3, 8, 2

    x = jax.random.normal(kx, (B, T, C_in), jnp.float32)
    params = init_params(kp, C_in, C_out, kernel_size, num_layers, inner_dim)

    fwd = jax.jit(functools.partial(
        contextnet_block, num_layers=num_layers, kernel_size=kernel_size,
        stride=stride, beta=1.0, residual=True))
    out = jax.block_until_ready(fwd(x, params))

    T_out = (T - 1) // stride + 1
    assert out.shape == (B, T_out, C_out), out.shape
    assert bool(jnp.all(jnp.isfinite(out)))
    print("KERNEL_OK")
</pallas_src>

<mosaic_0001>
module attributes {stable_mosaic.version = 11 : i64} {
  func.func @_dwsep_bn_stats_kernel(%arg0: i32, %arg1: memref<1x16x8xf32, #tpu.memory_space<vmem>>, %arg2: memref<3x8xf32, #tpu.memory_space<vmem>>, %arg3: memref<1x8xf32, #tpu.memory_space<vmem>>, %arg4: memref<8x16xf32, #tpu.memory_space<vmem>>, %arg5: memref<1x16xf32, #tpu.memory_space<vmem>>, %arg6: memref<1x16x16xf32, #tpu.memory_space<vmem>>, %arg7: memref<2x16xf32, #tpu.memory_space<vmem>>, %arg8: memref<25x8xf32, #tpu.memory_space<vmem>>) attributes {dimension_semantics = [#tpu.dimension_semantics<arbitrary>], iteration_bounds = array<i64: 2>, scalar_prefetch = 0 : i64, scratch_operands = 1 : i64, tpu.core_type = #tpu.core_type<tc>, window_params = [{transform_indices = @transform_0, window_bounds = array<i64: 1, 16, 8>}, {pipeline_mode = #tpu.pipeline_mode<synchronous>, transform_indices = @transform_1, window_bounds = array<i64: 3, 8>}, {pipeline_mode = #tpu.pipeline_mode<synchronous>, transform_indices = @transform_2, window_bounds = array<i64: 1, 8>}, {pipeline_mode = #tpu.pipeline_mode<synchronous>, transform_indices = @transform_3, window_bounds = array<i64: 8, 16>}, {pipeline_mode = #tpu.pipeline_mode<synchronous>, transform_indices = @transform_4, window_bounds = array<i64: 1, 16>}, {transform_indices = @transform_5, window_bounds = array<i64: 1, 16, 16>}, {pipeline_mode = #tpu.pipeline_mode<synchronous>, transform_indices = @transform_6, window_bounds = array<i64: 2, 16>}]} {
    %c0 = arith.constant 0 : index
    %c0_0 = arith.constant 0 : index
    %c0_1 = arith.constant 0 : index
    %0 = vector.load %arg1[%c0, %c0_0, %c0_1] : memref<1x16x8xf32, #tpu.memory_space<vmem>>, vector<1x16x8xf32>
    %1 = vector.shape_cast %0 : vector<1x16x8xf32> to vector<16x8xf32>
    %c8 = arith.constant 8 : index
    %c0_2 = arith.constant 0 : index
    %2 = vector.load %arg8[%c8, %c0_2] : memref<25x8xf32, #tpu.memory_space<vmem>>, vector<16x8xf32>
    tpu.vector_store %arg8[%c8, %c0_2], %1 {strides = array<i32>} : memref<25x8xf32, #tpu.memory_space<vmem>>, vector<16x8xf32>,
    %c9 = arith.constant 9 : index
    %c0_3 = arith.constant 0 : index
    %3 = vector.load %arg8[%c9, %c0_3] : memref<25x8xf32, #tpu.memory_space<vmem>>, vector<1x8xf32>
    %c7 = arith.constant 7 : index
    %c0_4 = arith.constant 0 : index
    %4 = vector.load %arg8[%c7, %c0_4] : memref<25x8xf32, #tpu.memory_space<vmem>>, vector<1x8xf32>
    tpu.vector_store %arg8[%c7, %c0_4], %3 {strides = array<i32>} : memref<25x8xf32, #tpu.memory_space<vmem>>, vector<1x8xf32>,
    %c22 = arith.constant 22 : index
    %c0_5 = arith.constant 0 : index
    %5 = vector.load %arg8[%c22, %c0_5] : memref<25x8xf32, #tpu.memory_space<vmem>>, vector<1x8xf32>
    %c24 = arith.constant 24 : index
    %c0_6 = arith.constant 0 : index
    %6 = vector.load %arg8[%c24, %c0_6] : memref<25x8xf32, #tpu.memory_space<vmem>>, vector<1x8xf32>
    tpu.vector_store %arg8[%c24, %c0_6], %5 {strides = array<i32>} : memref<25x8xf32, #tpu.memory_space<vmem>>, vector<1x8xf32>,
    %c0_7 = arith.constant 0 : index
    %c0_8 = arith.constant 0 : index
    %7 = vector.load %arg2[%c0_7, %c0_8] : memref<3x8xf32, #tpu.memory_space<vmem>>, vector<3x8xf32>
    %c7_9 = arith.constant 7 : index
    %c0_10 = arith.constant 0 : index
    %8 = vector.load %arg8[%c7_9, %c0_10] : memref<25x8xf32, #tpu.memory_space<vmem>>, vector<16x8xf32>
    %9 = vector.extract_strided_slice %7 {offsets = [0, 0], sizes = [1, 8], strides = [1, 1]} : vector<3x8xf32> to vector<1x8xf32>
    %10 = vector.broadcast %9 : vector<1x8xf32> to vector<16x8xf32>
    %11 = arith.mulf %8, %10 : vector<16x8xf32>
    %c8_11 = arith.constant 8 : index
    %c0_12 = arith.constant 0 : index
    %12 = vector.load %arg8[%c8_11, %c0_12] : memref<25x8xf32, #tpu.memory_space<vmem>>, vector<16x8xf32>
    %13 = vector.extract_strided_slice %7 {offsets = [1, 0], sizes = [1, 8], strides = [1, 1]} : vector<3x8xf32> to vector<1x8xf32>
    %14 = vector.broadcast %13 : vector<1x8xf32> to vector<16x8xf32>
    %15 = arith.mulf %12, %14 : vector<16x8xf32>
    %16 = arith.addf %11, %15 : vector<16x8xf32>
    %c9_13 = arith.constant 9 : index
    %c0_14 = arith.constant 0 : index
    %17 = vector.load %arg8[%c9_13, %c0_14] : memref<25x8xf32, #tpu.memory_space<vmem>>, vector<16x8xf32>
    %18 = vector.extract_strided_slice %7 {offsets = [2, 0], sizes = [1, 8], strides = [1, 1]} : vector<3x8xf32> to vector<1x8xf32>
    %19 = vector.broadcast %18 : vector<1x8xf32> to vector<16x8xf32>
    %20 = arith.mulf %17, %19 : vector<16x8xf32>
    %21 = arith.addf %16, %20 : vector<16x8xf32>
    %c0_15 = arith.constant 0 : index
    %c0_16 = arith.constant 0 : index
    %22 = vector.load %arg3[%c0_15, %c0_16] : memref<1x8xf32, #tpu.memory_space<vmem>>, vector<1x8xf32>
    %23 = vector.broadcast %22 : vector<1x8xf32> to vector<16x8xf32>
    %24 = arith.addf %21, %23 : vector<16x8xf32>
    %25 = arith.truncf %24 : vector<16x8xf32> to vector<16x8xbf16>
    %c0_17 = arith.constant 0 : index
    %c0_18 = arith.constant 0 : index
    %26 = vector.load %arg4[%c0_17, %c0_18] : memref<8x16xf32, #tpu.memory_space<vmem>>, vector<8x16xf32>
    %27 = arith.truncf %26 : vector<8x16xf32> to vector<8x16xbf16>
    %cst = arith.constant dense<0.000000e+00> : vector<16x16xf32>
    %28 = tpu.matmul %25, %27, %cst {dimension_numbers = #tpu.dot_dimension_numbers<[1], [0], [0], [1], [0, 0, 1, 1], [], []>} : vector<16x8xbf16>, vector<8x16xbf16>, vector<16x16xf32> -> vector<16x16xf32>
    %c0_19 = arith.constant 0 : index
    %c0_20 = arith.constant 0 : index
    %29 = vector.load %arg5[%c0_19, %c0_20] : memref<1x16xf32, #tpu.memory_space<vmem>>, vector<1x16xf32>
    %30 = vector.broadcast %29 : vector<1x16xf32> to vector<16x16xf32>
    %31 = arith.addf %28, %30 : vector<16x16xf32>
    %c0_21 = arith.constant 0 : index
    %c0_22 = arith.constant 0 : index
    %c0_23 = arith.constant 0 : index
    %32 = vector.load %arg6[%c0_21, %c0_22, %c0_23] : memref<1x16x16xf32, #tpu.memory_space<vmem>>, vector<1x16x16xf32>
    %33 = vector.shape_cast %32 : vector<1x16x16xf32> to vector<16x16xf32>
    %34 = vector.shape_cast %31 : vector<16x16xf32> to vector<1x16x16xf32>
    tpu.vector_store %arg6[%c0_21, %c0_22, %c0_23], %34 {strides = array<i32>} : memref<1x16x16xf32, #tpu.memory_space<vmem>>, vector<1x16x16xf32>,
    %c0_i32 = arith.constant 0 : i32
    %35 = arith.cmpi eq, %arg0, %c0_i32 : i32
    %36 = arith.extui %35 : i1 to i32
    %c0_i32_24 = arith.constant 0 : i32
    %37 = arith.cmpi ne, %36, %c0_i32_24 : i32
    scf.if %37 {
      %cst_31 = arith.constant 0.000000e+00 : f32
      %47 = vector.broadcast %cst_31 : f32 to vector<2x16xf32>
      %c0_32 = arith.constant 0 : index
      %c0_33 = arith.constant 0 : index
      %48 = vector.load %arg7[%c0_32, %c0_33] : memref<2x16xf32, #tpu.memory_space<vmem>>, vector<2x16xf32>
      tpu.vector_store %arg7[%c0_32, %c0_33], %47 {strides = array<i32>} : memref<2x16xf32, #tpu.memory_space<vmem>>, vector<2x16xf32>,
    } else {
    }
    %c0_25 = arith.constant 0 : index
    %c0_26 = arith.constant 0 : index
    %38 = vector.load %arg7[%c0_25, %c0_26] : memref<2x16xf32, #tpu.memory_space<vmem>>, vector<2x16xf32>
    %cst_27 = arith.constant dense<0.000000e+00> : vector<16xf32>
    %39 = vector.multi_reduction <add>, %31, %cst_27 [0] : vector<16x16xf32> to vector<16xf32>
    %40 = vector.shape_cast %39 : vector<16xf32> to vector<1x16xf32>
    %41 = arith.mulf %31, %31 : vector<16x16xf32>
    %cst_28 = arith.constant dense<0.000000e+00> : vector<16xf32>
    %42 = vector.multi_reduction <add>, %41, %cst_28 [0] : vector<16x16xf32> to vector<16xf32>
    %43 = vector.shape_cast %42 : vector<16xf32> to vector<1x16xf32>
    %44 = tpu.concatenate %40, %43 in 0 : vector<1x16xf32>, vector<1x16xf32> -> vector<2x16xf32>
    %45 = arith.addf %38, %44 : vector<2x16xf32>
    %c0_29 = arith.constant 0 : index
    %c0_30 = arith.constant 0 : index
    %46 = vector.load %arg7[%c0_29, %c0_30] : memref<2x16xf32, #tpu.memory_space<vmem>>, vector<2x16xf32>
    tpu.vector_store %arg7[%c0_29, %c0_30], %45 {strides = array<i32>} : memref<2x16xf32, #tpu.memory_space<vmem>>, vector<2x16xf32>,
    return
  }
  func.func @transform_0(%arg0: i32) -> (i32, i32, i32) {
    %c0_i32 = arith.constant 0 : i32
    %c0_i32_0 = arith.constant 0 : i32
    %c0_i32_1 = arith.constant 0 : i32
    return %arg0, %c0_i32, %c0_i32_0 : i32, i32, i32
  }
  func.func @transform_1(%arg0: i32) -> (i32, i32) {
    %c0_i32 = arith.constant 0 : i32
    %c0_i32_0 = arith.constant 0 : i32
    %c0_i32_1 = arith.constant 0 : i32
    return %c0_i32, %c0_i32_0 : i32, i32
  }
  func.func @transform_2(%arg0: i32) -> (i32, i32) {
    %c0_i32 = arith.constant 0 : i32
    %c0_i32_0 = arith.constant 0 : i32
    %c0_i32_1 = arith.constant 0 : i32
    return %c0_i32, %c0_i32_0 : i32, i32
  }
  func.func @transform_3(%arg0: i32) -> (i32, i32) {
    %c0_i32 = arith.constant 0 : i32
    %c0_i32_0 = arith.constant 0 : i32
    %c0_i32_1 = arith.constant 0 : i32
    return %c0_i32, %c0_i32_0 : i32, i32
  }
  func.func @transform_4(%arg0: i32) -> (i32, i32) {
    %c0_i32 = arith.constant 0 : i32
    %c0_i32_0 = arith.constant 0 : i32
    %c0_i32_1 = arith.constant 0 : i32
    return %c0_i32, %c0_i32_0 : i32, i32
  }
  func.func @transform_5(%arg0: i32) -> (i32, i32, i32) {
    %c0_i32 = arith.constant 0 : i32
    %c0_i32_0 = arith.constant 0 : i32
    %c0_i32_1 = arith.constant 0 : i32
    return %arg0, %c0_i32, %c0_i32_0 : i32, i32, i32
  }
  func.func @transform_6(%arg0: i32) -> (i32, i32) {
    %c0_i32 = arith.constant 0 : i32
    %c0_i32_0 = arith.constant 0 : i32
    %c0_i32_1 = arith.constant 0 : i32
    return %c0_i32, %c0_i32_0 : i32, i32
  }
}

module attributes {stable_mosaic.version = 11 : i64} {
  func.func @_dwsep_bn_stats_kernel(%arg0: i32, %arg1: memref<1x16x16xf32, #tpu.memory_space<vmem>>, %arg2: memref<3x16xf32, #tpu.memory_space<vmem>>, %arg3: memref<1x16xf32, #tpu.memory_space<vmem>>, %arg4: memref<16x16xf32, #tpu.memory_space<vmem>>, %arg5: memref<1x16xf32, #tpu.memory_space<vmem>>, %arg6: memref<1x8x16xf32, #tpu.memory_space<vmem>>, %arg7: memref<2x16xf32, #tpu.memory_space<vmem>>, %arg8: memref<25x16xf32, #tpu.memory_space<vmem>>) attributes {dimension_semantics = [#tpu.dimension_semantics<arbitrary>], iteration_bounds = array<i64: 2>, scalar_prefetch = 0 : i64, scratch_operands = 1 : i64, tpu.core_type = #tpu.core_type<tc>, window_params = [{transform_indices = @transform_0, window_bounds = array<i64: 1, 16, 16>}, {pipeline_mode = #tpu.pipeline_mode<synchronous>, transform_indices = @transform_1, window_bounds = array<i64: 3, 16>}, {pipeline_mode = #tpu.pipeline_mode<synchronous>, transform_indices = @transform_2, window_bounds = array<i64: 1, 16>}, {pipeline_mode = #tpu.pipeline_mode<synchronous>, transform_indices = @transform_3, window_bounds = array<i64: 16, 16>}, {pipeline_mode = #tpu.pipeline_mode<synchronous>, transform_indices = @transform_4, window_bounds = array<i64: 1, 16>}, {transform_indices = @transform_5, window_bounds = array<i64: 1, 8, 16>}, {pipeline_mode = #tpu.pipeline_mode<synchronous>, transform_indices = @transform_6, window_bounds = array<i64: 2, 16>}]} {
    %c0 = arith.constant 0 : index
    %c0_0 = arith.constant 0 : index
    %c0_1 = arith.constant 0 : index
    %0 = vector.load %arg1[%c0, %c0_0, %c0_1] : memref<1x16x16xf32, #tpu.memory_space<vmem>>, vector<1x16x16xf32>
    %1 = vector.shape_cast %0 : vector<1x16x16xf32> to vector<16x16xf32>
    %c8 = arith.constant 8 : index
    %c0_2 = arith.constant 0 : index
    %2 = vector.load %arg8[%c8, %c0_2] : memref<25x16xf32, #tpu.memory_space<vmem>>, vector<16x16xf32>
    tpu.vector_store %arg8[%c8, %c0_2], %1 {strides = array<i32>} : memref<25x16xf32, #tpu.memory_space<vmem>>, vector<16x16xf32>,
    %c9 = arith.constant 9 : index
    %c0_3 = arith.constant 0 : index
    %3 = vector.load %arg8[%c9, %c0_3] : memref<25x16xf32, #tpu.memory_space<vmem>>, vector<1x16xf32>
    %c7 = arith.constant 7 : index
    %c0_4 = arith.constant 0 : index
    %4 = vector.load %arg8[%c7, %c0_4] : memref<25x16xf32, #tpu.memory_space<vmem>>, vector<1x16xf32>
    tpu.vector_store %arg8[%c7, %c0_4], %3 {strides = array<i32>} : memref<25x16xf32, #tpu.memory_space<vmem>>, vector<1x16xf32>,
    %c22 = arith.constant 22 : index
    %c0_5 = arith.constant 0 : index
    %5 = vector.load %arg8[%c22, %c0_5] : memref<25x16xf32, #tpu.memory_space<vmem>>, vector<1x16xf32>
    %c24 = arith.constant 24 : index
    %c0_6 = arith.constant 0 : index
    %6 = vector.load %arg8[%c24, %c0_6] : memref<25x16xf32, #tpu.memory_space<vmem>>, vector<1x16xf32>
    tpu.vector_store %arg8[%c24, %c0_6], %5 {strides = array<i32>} : memref<25x16xf32, #tpu.memory_space<vmem>>, vector<1x16xf32>,
    %c0_7 = arith.constant 0 : index
    %c0_8 = arith.constant 0 : index
    %7 = vector.load %arg2[%c0_7, %c0_8] : memref<3x16xf32, #tpu.memory_space<vmem>>, vector<3x16xf32>
    %c7_9 = arith.constant 7 : index
    %c0_10 = arith.constant 0 : index
    %8 = tpu.strided_load %arg8[%c7_9, %c0_10] {strides = array<i32: 2, 1>} : memref<25x16xf32, #tpu.memory_space<vmem>>, vector<8x16xf32>
    %9 = vector.extract_strided_slice %7 {offsets = [0, 0], sizes = [1, 16], strides = [1, 1]} : vector<3x16xf32> to vector<1x16xf32>
    %10 = vector.broadcast %9 : vector<1x16xf32> to vector<8x16xf32>
    %11 = arith.mulf %8, %10 : vector<8x16xf32>
    %c8_11 = arith.constant 8 : index
    %c0_12 = arith.constant 0 : index
    %12 = tpu.strided_load %arg8[%c8_11, %c0_12] {strides = array<i32: 2, 1>} : memref<25x16xf32, #tpu.memory_space<vmem>>, vector<8x16xf32>
    %13 = vector.extract_strided_slice %7 {offsets = [1, 0], sizes = [1, 16], strides = [1, 1]} : vector<3x16xf32> to vector<1x16xf32>
    %14 = vector.broadcast %13 : vector<1x16xf32> to vector<8x16xf32>
    %15 = arith.mulf %12, %14 : vector<8x16xf32>
    %16 = arith.addf %11, %15 : vector<8x16xf32>
    %c9_13 = arith.constant 9 : index
    %c0_14 = arith.constant 0 : index
    %17 = tpu.strided_load %arg8[%c9_13, %c0_14] {strides = array<i32: 2, 1>} : memref<25x16xf32, #tpu.memory_space<vmem>>, vector<8x16xf32>
    %18 = vector.extract_strided_slice %7 {offsets = [2, 0], sizes = [1, 16], strides = [1, 1]} : vector<3x16xf32> to vector<1x16xf32>
    %19 = vector.broadcast %18 : vector<1x16xf32> to vector<8x16xf32>
    %20 = arith.mulf %17, %19 : vector<8x16xf32>
    %21 = arith.addf %16, %20 : vector<8x16xf32>
    %c0_15 = arith.constant 0 : index
    %c0_16 = arith.constant 0 : index
    %22 = vector.load %arg3[%c0_15, %c0_16] : memref<1x16xf32, #tpu.memory_space<vmem>>, vector<1x16xf32>
    %23 = vector.broadcast %22 : vector<1x16xf32> to vector<8x16xf32>
    %24 = arith.addf %21, %23 : vector<8x16xf32>
    %25 = arith.truncf %24 : vector<8x16xf32> to vector<8x16xbf16>
    %c0_17 = arith.constant 0 : index
    %c0_18 = arith.constant 0 : index
    %26 = vector.load %arg4[%c0_17, %c0_18] : memref<16x16xf32, #tpu.memory_space<vmem>>, vector<16x16xf32>
    %27 = arith.truncf %26 : vector<16x16xf32> to vector<16x16xbf16>
    %cst = arith.constant dense<0.000000e+00> : vector<8x16xf32>
    %28 = tpu.matmul %25, %27, %cst {dimension_numbers = #tpu.dot_dimension_numbers<[1], [0], [0], [1], [0, 0, 1, 1], [], []>} : vector<8x16xbf16>, vector<16x16xbf16>, vector<8x16xf32> -> vector<8x16xf32>
    %c0_19 = arith.constant 0 : index
    %c0_20 = arith.constant 0 : index
    %29 = vector.load %arg5[%c0_19, %c0_20] : memref<1x16xf32, #tpu.memory_space<vmem>>, vector<1x16xf32>
    %30 = vector.broadcast %29 : vector<1x16xf32> to vector<8x16xf32>
    %31 = arith.addf %28, %30 : vector<8x16xf32>
    %c0_21 = arith.constant 0 : index
    %c0_22 = arith.constant 0 : index
    %c0_23 = arith.constant 0 : index
    %32 = vector.load %arg6[%c0_21, %c0_22, %c0_23] : memref<1x8x16xf32, #tpu.memory_space<vmem>>, vector<1x8x16xf32>
    %33 = vector.shape_cast %32 : vector<1x8x16xf32> to vector<8x16xf32>
    %34 = vector.shape_cast %31 : vector<8x16xf32> to vector<1x8x16xf32>
    tpu.vector_store %arg6[%c0_21, %c0_22, %c0_23], %34 {strides = array<i32>} : memref<1x8x16xf32, #tpu.memory_space<vmem>>, vector<1x8x16xf32>,
    %c0_i32 = arith.constant 0 : i32
    %35 = arith.cmpi eq, %arg0, %c0_i32 : i32
    %36 = arith.extui %35 : i1 to i32
    %c0_i32_24 = arith.constant 0 : i32
    %37 = arith.cmpi ne, %36, %c0_i32_24 : i32
    scf.if %37 {
      %cst_31 = arith.constant 0.000000e+00 : f32
      %47 = vector.broadcast %cst_31 : f32 to vector<2x16xf32>
      %c0_32 = arith.constant 0 : index
      %c0_33 = arith.constant 0 : index
      %48 = vector.load %arg7[%c0_32, %c0_33] : memref<2x16xf32, #tpu.memory_space<vmem>>, vector<2x16xf32>
      tpu.vector_store %arg7[%c0_32, %c0_33], %47 {strides = array<i32>} : memref<2x16xf32, #tpu.memory_space<vmem>>, vector<2x16xf32>,
    } else {
    }
    %c0_25 = arith.constant 0 : index
    %c0_26 = arith.constant 0 : index
    %38 = vector.load %arg7[%c0_25, %c0_26] : memref<2x16xf32, #tpu.memory_space<vmem>>, vector<2x16xf32>
    %cst_27 = arith.constant dense<0.000000e+00> : vector<16xf32>
    %39 = vector.multi_reduction <add>, %31, %cst_27 [0] : vector<8x16xf32> to vector<16xf32>
    %40 = vector.shape_cast %39 : vector<16xf32> to vector<1x16xf32>
    %41 = arith.mulf %31, %31 : vector<8x16xf32>
    %cst_28 = arith.constant dense<0.000000e+00> : vector<16xf32>
    %42 = vector.multi_reduction <add>, %41, %cst_28 [0] : vector<8x16xf32> to vector<16xf32>
    %43 = vector.shape_cast %42 : vector<16xf32> to vector<1x16xf32>
    %44 = tpu.concatenate %40, %43 in 0 : vector<1x16xf32>, vector<1x16xf32> -> vector<2x16xf32>
    %45 = arith.addf %38, %44 : vector<2x16xf32>
    %c0_29 = arith.constant 0 : index
    %c0_30 = arith.constant 0 : index
    %46 = vector.load %arg7[%c0_29, %c0_30] : memref<2x16xf32, #tpu.memory_space<vmem>>, vector<2x16xf32>
    tpu.vector_store %arg7[%c0_29, %c0_30], %45 {strides = array<i32>} : memref<2x16xf32, #tpu.memory_space<vmem>>, vector<2x16xf32>,
    return
  }
  func.func @transform_0(%arg0: i32) -> (i32, i32, i32) {
    %c0_i32 = arith.constant 0 : i32
    %c0_i32_0 = arith.constant 0 : i32
    %c0_i32_1 = arith.constant 0 : i32
    return %arg0, %c0_i32, %c0_i32_0 : i32, i32, i32
  }
  func.func @transform_1(%arg0: i32) -> (i32, i32) {
    %c0_i32 = arith.constant 0 : i32
    %c0_i32_0 = arith.constant 0 : i32
    %c0_i32_1 = arith.constant 0 : i32
    return %c0_i32, %c0_i32_0 : i32, i32
  }
  func.func @transform_2(%arg0: i32) -> (i32, i32) {
    %c0_i32 = arith.constant 0 : i32
    %c0_i32_0 = arith.constant 0 : i32
    %c0_i32_1 = arith.constant 0 : i32
    return %c0_i32, %c0_i32_0 : i32, i32
  }
  func.func @transform_3(%arg0: i32) -> (i32, i32) {
    %c0_i32 = arith.constant 0 : i32
    %c0_i32_0 = arith.constant 0 : i32
    %c0_i32_1 = arith.constant 0 : i32
    return %c0_i32, %c0_i32_0 : i32, i32
  }
  func.func @transform_4(%arg0: i32) -> (i32, i32) {
    %c0_i32 = arith.constant 0 : i32
    %c0_i32_0 = arith.constant 0 : i32
    %c0_i32_1 = arith.constant 0 : i32
    return %c0_i32, %c0_i32_0 : i32, i32
  }
  func.func @transform_5(%arg0: i32) -> (i32, i32, i32) {
    %c0_i32 = arith.constant 0 : i32
    %c0_i32_0 = arith.constant 0 : i32
    %c0_i32_1 = arith.constant 0 : i32
    return %arg0, %c0_i32, %c0_i32_0 : i32, i32, i32
  }
  func.func @transform_6(%arg0: i32) -> (i32, i32) {
    %c0_i32 = arith.constant 0 : i32
    %c0_i32_0 = arith.constant 0 : i32
    %c0_i32_1 = arith.constant 0 : i32
    return %c0_i32, %c0_i32_0 : i32, i32
  }
}

module attributes {stable_mosaic.version = 11 : i64} {
  func.func @_dwsep_bn_stats_kernel(%arg0: i32, %arg1: memref<1x16x16xf32, #tpu.memory_space<vmem>>, %arg2: memref<3x16xf32, #tpu.memory_space<vmem>>, %arg3: memref<1x16xf32, #tpu.memory_space<vmem>>, %arg4: memref<16x16xf32, #tpu.memory_space<vmem>>, %arg5: memref<1x16xf32, #tpu.memory_space<vmem>>, %arg6: memref<1x16x16xf32, #tpu.memory_space<vmem>>, %arg7: memref<2x16xf32, #tpu.memory_space<vmem>>, %arg8: memref<25x16xf32, #tpu.memory_space<vmem>>) attributes {dimension_semantics = [#tpu.dimension_semantics<arbitrary>], iteration_bounds = array<i64: 2>, scalar_prefetch = 0 : i64, scratch_operands = 1 : i64, tpu.core_type = #tpu.core_type<tc>, window_params = [{transform_indices = @transform_0, window_bounds = array<i64: 1, 16, 16>}, {pipeline_mode = #tpu.pipeline_mode<synchronous>, transform_indices = @transform_1, window_bounds = array<i64: 3, 16>}, {pipeline_mode = #tpu.pipeline_mode<synchronous>, transform_indices = @transform_2, window_bounds = array<i64: 1, 16>}, {pipeline_mode = #tpu.pipeline_mode<synchronous>, transform_indices = @transform_3, window_bounds = array<i64: 16, 16>}, {pipeline_mode = #tpu.pipeline_mode<synchronous>, transform_indices = @transform_4, window_bounds = array<i64: 1, 16>}, {transform_indices = @transform_5, window_bounds = array<i64: 1, 16, 16>}, {pipeline_mode = #tpu.pipeline_mode<synchronous>, transform_indices = @transform_6, window_bounds = array<i64: 2, 16>}]} {
    %c0 = arith.constant 0 : index
    %c0_0 = arith.constant 0 : index
    %c0_1 = arith.constant 0 : index
    %0 = vector.load %arg1[%c0, %c0_0, %c0_1] : memref<1x16x16xf32, #tpu.memory_space<vmem>>, vector<1x16x16xf32>
    %1 = vector.shape_cast %0 : vector<1x16x16xf32> to vector<16x16xf32>
    %c8 = arith.constant 8 : index
    %c0_2 = arith.constant 0 : index
    %2 = vector.load %arg8[%c8, %c0_2] : memref<25x16xf32, #tpu.memory_space<vmem>>, vector<16x16xf32>
    tpu.vector_store %arg8[%c8, %c0_2], %1 {strides = array<i32>} : memref<25x16xf32, #tpu.memory_space<vmem>>, vector<16x16xf32>,
    %c9 = arith.constant 9 : index
    %c0_3 = arith.constant 0 : index
    %3 = vector.load %arg8[%c9, %c0_3] : memref<25x16xf32, #tpu.memory_space<vmem>>, vector<1x16xf32>
    %c7 = arith.constant 7 : index
    %c0_4 = arith.constant 0 : index
    %4 = vector.load %arg8[%c7, %c0_4] : memref<25x16xf32, #tpu.memory_space<vmem>>, vector<1x16xf32>
    tpu.vector_store %arg8[%c7, %c0_4], %3 {strides = array<i32>} : memref<25x16xf32, #tpu.memory_space<vmem>>, vector<1x16xf32>,
    %c22 = arith.constant 22 : index
    %c0_5 = arith.constant 0 : index
    %5 = vector.load %arg8[%c22, %c0_5] : memref<25x16xf32, #tpu.memory_space<vmem>>, vector<1x16xf32>
    %c24 = arith.constant 24 : index
    %c0_6 = arith.constant 0 : index
    %6 = vector.load %arg8[%c24, %c0_6] : memref<25x16xf32, #tpu.memory_space<vmem>>, vector<1x16xf32>
    tpu.vector_store %arg8[%c24, %c0_6], %5 {strides = array<i32>} : memref<25x16xf32, #tpu.memory_space<vmem>>, vector<1x16xf32>,
    %c0_7 = arith.constant 0 : index
    %c0_8 = arith.constant 0 : index
    %7 = vector.load %arg2[%c0_7, %c0_8] : memref<3x16xf32, #tpu.memory_space<vmem>>, vector<3x16xf32>
    %c7_9 = arith.constant 7 : index
    %c0_10 = arith.constant 0 : index
    %8 = vector.load %arg8[%c7_9, %c0_10] : memref<25x16xf32, #tpu.memory_space<vmem>>, vector<16x16xf32>
    %9 = vector.extract_strided_slice %7 {offsets = [0, 0], sizes = [1, 16], strides = [1, 1]} : vector<3x16xf32> to vector<1x16xf32>
    %10 = vector.broadcast %9 : vector<1x16xf32> to vector<16x16xf32>
    %11 = arith.mulf %8, %10 : vector<16x16xf32>
    %c8_11 = arith.constant 8 : index
    %c0_12 = arith.constant 0 : index
    %12 = vector.load %arg8[%c8_11, %c0_12] : memref<25x16xf32, #tpu.memory_space<vmem>>, vector<16x16xf32>
    %13 = vector.extract_strided_slice %7 {offsets = [1, 0], sizes = [1, 16], strides = [1, 1]} : vector<3x16xf32> to vector<1x16xf32>
    %14 = vector.broadcast %13 : vector<1x16xf32> to vector<16x16xf32>
    %15 = arith.mulf %12, %14 : vector<16x16xf32>
    %16 = arith.addf %11, %15 : vector<16x16xf32>
    %c9_13 = arith.constant 9 : index
    %c0_14 = arith.constant 0 : index
    %17 = vector.load %arg8[%c9_13, %c0_14] : memref<25x16xf32, #tpu.memory_space<vmem>>, vector<16x16xf32>
    %18 = vector.extract_strided_slice %7 {offsets = [2, 0], sizes = [1, 16], strides = [1, 1]} : vector<3x16xf32> to vector<1x16xf32>
    %19 = vector.broadcast %18 : vector<1x16xf32> to vector<16x16xf32>
    %20 = arith.mulf %17, %19 : vector<16x16xf32>
    %21 = arith.addf %16, %20 : vector<16x16xf32>
    %c0_15 = arith.constant 0 : index
    %c0_16 = arith.constant 0 : index
    %22 = vector.load %arg3[%c0_15, %c0_16] : memref<1x16xf32, #tpu.memory_space<vmem>>, vector<1x16xf32>
    %23 = vector.broadcast %22 : vector<1x16xf32> to vector<16x16xf32>
    %24 = arith.addf %21, %23 : vector<16x16xf32>
    %25 = arith.truncf %24 : vector<16x16xf32> to vector<16x16xbf16>
    %c0_17 = arith.constant 0 : index
    %c0_18 = arith.constant 0 : index
    %26 = vector.load %arg4[%c0_17, %c0_18] : memref<16x16xf32, #tpu.memory_space<vmem>>, vector<16x16xf32>
    %27 = arith.truncf %26 : vector<16x16xf32> to vector<16x16xbf16>
    %cst = arith.constant dense<0.000000e+00> : vector<16x16xf32>
    %28 = tpu.matmul %25, %27, %cst {dimension_numbers = #tpu.dot_dimension_numbers<[1], [0], [0], [1], [0, 0, 1, 1], [], []>} : vector<16x16xbf16>, vector<16x16xbf16>, vector<16x16xf32> -> vector<16x16xf32>
    %c0_19 = arith.constant 0 : index
    %c0_20 = arith.constant 0 : index
    %29 = vector.load %arg5[%c0_19, %c0_20] : memref<1x16xf32, #tpu.memory_space<vmem>>, vector<1x16xf32>
    %30 = vector.broadcast %29 : vector<1x16xf32> to vector<16x16xf32>
    %31 = arith.addf %28, %30 : vector<16x16xf32>
    %c0_21 = arith.constant 0 : index
    %c0_22 = arith.constant 0 : index
    %c0_23 = arith.constant 0 : index
    %32 = vector.load %arg6[%c0_21, %c0_22, %c0_23] : memref<1x16x16xf32, #tpu.memory_space<vmem>>, vector<1x16x16xf32>
    %33 = vector.shape_cast %32 : vector<1x16x16xf32> to vector<16x16xf32>
    %34 = vector.shape_cast %31 : vector<16x16xf32> to vector<1x16x16xf32>
    tpu.vector_store %arg6[%c0_21, %c0_22, %c0_23], %34 {strides = array<i32>} : memref<1x16x16xf32, #tpu.memory_space<vmem>>, vector<1x16x16xf32>,
    %c0_i32 = arith.constant 0 : i32
    %35 = arith.cmpi eq, %arg0, %c0_i32 : i32
    %36 = arith.extui %35 : i1 to i32
    %c0_i32_24 = arith.constant 0 : i32
    %37 = arith.cmpi ne, %36, %c0_i32_24 : i32
    scf.if %37 {
      %cst_31 = arith.constant 0.000000e+00 : f32
      %47 = vector.broadcast %cst_31 : f32 to vector<2x16xf32>
      %c0_32 = arith.constant 0 : index
      %c0_33 = arith.constant 0 : index
      %48 = vector.load %arg7[%c0_32, %c0_33] : memref<2x16xf32, #tpu.memory_space<vmem>>, vector<2x16xf32>
      tpu.vector_store %arg7[%c0_32, %c0_33], %47 {strides = array<i32>} : memref<2x16xf32, #tpu.memory_space<vmem>>, vector<2x16xf32>,
    } else {
    }
    %c0_25 = arith.constant 0 : index
    %c0_26 = arith.constant 0 : index
    %38 = vector.load %arg7[%c0_25, %c0_26] : memref<2x16xf32, #tpu.memory_space<vmem>>, vector<2x16xf32>
    %cst_27 = arith.constant dense<0.000000e+00> : vector<16xf32>
    %39 = vector.multi_reduction <add>, %31, %cst_27 [0] : vector<16x16xf32> to vector<16xf32>
    %40 = vector.shape_cast %39 : vector<16xf32> to vector<1x16xf32>
    %41 = arith.mulf %31, %31 : vector<16x16xf32>
    %cst_28 = arith.constant dense<0.000000e+00> : vector<16xf32>
    %42 = vector.multi_reduction <add>, %41, %cst_28 [0] : vector<16x16xf32> to vector<16xf32>
    %43 = vector.shape_cast %42 : vector<16xf32> to vector<1x16xf32>
    %44 = tpu.concatenate %40, %43 in 0 : vector<1x16xf32>, vector<1x16xf32> -> vector<2x16xf32>
    %45 = arith.addf %38, %44 : vector<2x16xf32>
    %c0_29 = arith.constant 0 : index
    %c0_30 = arith.constant 0 : index
    %46 = vector.load %arg7[%c0_29, %c0_30] : memref<2x16xf32, #tpu.memory_space<vmem>>, vector<2x16xf32>
    tpu.vector_store %arg7[%c0_29, %c0_30], %45 {strides = array<i32>} : memref<2x16xf32, #tpu.memory_space<vmem>>, vector<2x16xf32>,
    return
  }
  func.func @transform_0(%arg0: i32) -> (i32, i32, i32) {
    %c0_i32 = arith.constant 0 : i32
    %c0_i32_0 = arith.constant 0 : i32
    %c0_i32_1 = arith.constant 0 : i32
    return %arg0, %c0_i32, %c0_i32_0 : i32, i32, i32
  }
  func.func @transform_1(%arg0: i32) -> (i32, i32) {
    %c0_i32 = arith.constant 0 : i32
    %c0_i32_0 = arith.constant 0 : i32
    %c0_i32_1 = arith.constant 0 : i32
    return %c0_i32, %c0_i32_0 : i32, i32
  }
  func.func @transform_2(%arg0: i32) -> (i32, i32) {
    %c0_i32 = arith.constant 0 : i32
    %c0_i32_0 = arith.constant 0 : i32
    %c0_i32_1 = arith.constant 0 : i32
    return %c0_i32, %c0_i32_0 : i32, i32
  }
  func.func @transform_3(%arg0: i32) -> (i32, i32) {
    %c0_i32 = arith.constant 0 : i32
    %c0_i32_0 = arith.constant 0 : i32
    %c0_i32_1 = arith.constant 0 : i32
    return %c0_i32, %c0_i32_0 : i32, i32
  }
  func.func @transform_4(%arg0: i32) -> (i32, i32) {
    %c0_i32 = arith.constant 0 : i32
    %c0_i32_0 = arith.constant 0 : i32
    %c0_i32_1 = arith.constant 0 : i32
    return %c0_i32, %c0_i32_0 : i32, i32
  }
  func.func @transform_5(%arg0: i32) -> (i32, i32, i32) {
    %c0_i32 = arith.constant 0 : i32
    %c0_i32_0 = arith.constant 0 : i32
    %c0_i32_1 = arith.constant 0 : i32
    return %arg0, %c0_i32, %c0_i32_0 : i32, i32, i32
  }
  func.func @transform_6(%arg0: i32) -> (i32, i32) {
    %c0_i32 = arith.constant 0 : i32
    %c0_i32_0 = arith.constant 0 : i32
    %c0_i32_1 = arith.constant 0 : i32
    return %c0_i32, %c0_i32_0 : i32, i32
  }
}

module attributes {stable_mosaic.version = 11 : i64} {
  func.func @_dwsep_bn_stats_kernel(%arg0: i32, %arg1: memref<1x8x16xf32, #tpu.memory_space<vmem>>, %arg2: memref<1x16xf32, #tpu.memory_space<vmem>>, %arg3: memref<1x16xf32, #tpu.memory_space<vmem>>, %arg4: memref<16x16xf32, #tpu.memory_space<vmem>>, %arg5: memref<1x16xf32, #tpu.memory_space<vmem>>, %arg6: memref<1x8x16xf32, #tpu.memory_space<vmem>>, %arg7: memref<2x16xf32, #tpu.memory_space<vmem>>) attributes {dimension_semantics = [#tpu.dimension_semantics<arbitrary>], iteration_bounds = array<i64: 2>, scalar_prefetch = 0 : i64, scratch_operands = 0 : i64, tpu.core_type = #tpu.core_type<tc>, window_params = [{transform_indices = @transform_0, window_bounds = array<i64: 1, 8, 16>}, {pipeline_mode = #tpu.pipeline_mode<synchronous>, transform_indices = @transform_1, window_bounds = array<i64: 1, 16>}, {pipeline_mode = #tpu.pipeline_mode<synchronous>, transform_indices = @transform_2, window_bounds = array<i64: 1, 16>}, {pipeline_mode = #tpu.pipeline_mode<synchronous>, transform_indices = @transform_3, window_bounds = array<i64: 16, 16>}, {pipeline_mode = #tpu.pipeline_mode<synchronous>, transform_indices = @transform_4, window_bounds = array<i64: 1, 16>}, {transform_indices = @transform_5, window_bounds = array<i64: 1, 8, 16>}, {pipeline_mode = #tpu.pipeline_mode<synchronous>, transform_indices = @transform_6, window_bounds = array<i64: 2, 16>}]} {
    %c0 = arith.constant 0 : index
    %c0_0 = arith.constant 0 : index
    %0 = vector.load %arg2[%c0, %c0_0] : memref<1x16xf32, #tpu.memory_space<vmem>>, vector<1x16xf32>
    %c0_1 = arith.constant 0 : index
    %c0_2 = arith.constant 0 : index
    %c0_3 = arith.constant 0 : index
    %1 = vector.load %arg1[%c0_1, %c0_2, %c0_3] : memref<1x8x16xf32, #tpu.memory_space<vmem>>, vector<1x8x16xf32>
    %2 = vector.shape_cast %1 : vector<1x8x16xf32> to vector<8x16xf32>
    %3 = vector.broadcast %0 : vector<1x16xf32> to vector<8x16xf32>
    %4 = arith.mulf %2, %3 : vector<8x16xf32>
    %c0_4 = arith.constant 0 : index
    %c0_5 = arith.constant 0 : index
    %5 = vector.load %arg3[%c0_4, %c0_5] : memref<1x16xf32, #tpu.memory_space<vmem>>, vector<1x16xf32>
    %6 = vector.broadcast %5 : vector<1x16xf32> to vector<8x16xf32>
    %7 = arith.addf %4, %6 : vector<8x16xf32>
    %8 = arith.truncf %7 : vector<8x16xf32> to vector<8x16xbf16>
    %c0_6 = arith.constant 0 : index
    %c0_7 = arith.constant 0 : index
    %9 = vector.load %arg4[%c0_6, %c0_7] : memref<16x16xf32, #tpu.memory_space<vmem>>, vector<16x16xf32>
    %10 = arith.truncf %9 : vector<16x16xf32> to vector<16x16xbf16>
    %cst = arith.constant dense<0.000000e+00> : vector<8x16xf32>
    %11 = tpu.matmul %8, %10, %cst {dimension_numbers = #tpu.dot_dimension_numbers<[1], [0], [0], [1], [0, 0, 1, 1], [], []>} : vector<8x16xbf16>, vector<16x16xbf16>, vector<8x16xf32> -> vector<8x16xf32>
    %c0_8 = arith.constant 0 : index
    %c0_9 = arith.constant 0 : index
    %12 = vector.load %arg5[%c0_8, %c0_9] : memref<1x16xf32, #tpu.memory_space<vmem>>, vector<1x16xf32>
    %13 = vector.broadcast %12 : vector<1x16xf32> to vector<8x16xf32>
    %14 = arith.addf %11, %13 : vector<8x16xf32>
    %c0_10 = arith.constant 0 : index
    %c0_11 = arith.constant 0 : index
    %c0_12 = arith.constant 0 : index
    %15 = vector.load %arg6[%c0_10, %c0_11, %c0_12] : memref<1x8x16xf32, #tpu.memory_space<vmem>>, vector<1x8x16xf32>
    %16 = vector.shape_cast %15 : vector<1x8x16xf32> to vector<8x16xf32>
    %17 = vector.shape_cast %14 : vector<8x16xf32> to vector<1x8x16xf32>
    tpu.vector_store %arg6[%c0_10, %c0_11, %c0_12], %17 {strides = array<i32>} : memref<1x8x16xf32, #tpu.memory_space<vmem>>, vector<1x8x16xf32>,
    %c0_i32 = arith.constant 0 : i32
    %18 = arith.cmpi eq, %arg0, %c0_i32 : i32
    %19 = arith.extui %18 : i1 to i32
    %c0_i32_13 = arith.constant 0 : i32
    %20 = arith.cmpi ne, %19, %c0_i32_13 : i32
    scf.if %20 {
      %cst_20 = arith.constant 0.000000e+00 : f32
      %30 = vector.broadcast %cst_20 : f32 to vector<2x16xf32>
      %c0_21 = arith.constant 0 : index
      %c0_22 = arith.constant 0 : index
      %31 = vector.load %arg7[%c0_21, %c0_22] : memref<2x16xf32, #tpu.memory_space<vmem>>, vector<2x16xf32>
      tpu.vector_store %arg7[%c0_21, %c0_22], %30 {strides = array<i32>} : memref<2x16xf32, #tpu.memory_space<vmem>>, vector<2x16xf32>,
    } else {
    }
    %c0_14 = arith.constant 0 : index
    %c0_15 = arith.constant 0 : index
    %21 = vector.load %arg7[%c0_14, %c0_15] : memref<2x16xf32, #tpu.memory_space<vmem>>, vector<2x16xf32>
    %cst_16 = arith.constant dense<0.000000e+00> : vector<16xf32>
    %22 = vector.multi_reduction <add>, %14, %cst_16 [0] : vector<8x16xf32> to vector<16xf32>
    %23 = vector.shape_cast %22 : vector<16xf32> to vector<1x16xf32>
    %24 = arith.mulf %14, %14 : vector<8x16xf32>
    %cst_17 = arith.constant dense<0.000000e+00> : vector<16xf32>
    %25 = vector.multi_reduction <add>, %24, %cst_17 [0] : vector<8x16xf32> to vector<16xf32>
    %26 = vector.shape_cast %25 : vector<16xf32> to vector<1x16xf32>
    %27 = tpu.concatenate %23, %26 in 0 : vector<1x16xf32>, vector<1x16xf32> -> vector<2x16xf32>
    %28 = arith.addf %21, %27 : vector<2x16xf32>
    %c0_18 = arith.constant 0 : index
    %c0_19 = arith.constant 0 : index
    %29 = vector.load %arg7[%c0_18, %c0_19] : memref<2x16xf32, #tpu.memory_space<vmem>>, vector<2x16xf32>
    tpu.vector_store %arg7[%c0_18, %c0_19], %28 {strides = array<i32>} : memref<2x16xf32, #tpu.memory_space<vmem>>, vector<2x16xf32>,
    return
  }
  func.func @transform_0(%arg0: i32) -> (i32, i32, i32) {
    %c0_i32 = arith.constant 0 : i32
    %c0_i32_0 = arith.constant 0 : i32
    %c0_i32_1 = arith.constant 0 : i32
    return %arg0, %c0_i32, %c0_i32_0 : i32, i32, i32
  }
  func.func @transform_1(%arg0: i32) -> (i32, i32) {
    %c0_i32 = arith.constant 0 : i32
    %c0_i32_0 = arith.constant 0 : i32
    %c0_i32_1 = arith.constant 0 : i32
    return %c0_i32, %c0_i32_0 : i32, i32
  }
  func.func @transform_2(%arg0: i32) -> (i32, i32) {
    %c0_i32 = arith.constant 0 : i32
    %c0_i32_0 = arith.constant 0 : i32
    %c0_i32_1 = arith.constant 0 : i32
    return %c0_i32, %c0_i32_0 : i32, i32
  }
  func.func @transform_3(%arg0: i32) -> (i32, i32) {
    %c0_i32 = arith.constant 0 : i32
    %c0_i32_0 = arith.constant 0 : i32
    %c0_i32_1 = arith.constant 0 : i32
    return %c0_i32, %c0_i32_0 : i32, i32
  }
  func.func @transform_4(%arg0: i32) -> (i32, i32) {
    %c0_i32 = arith.constant 0 : i32
    %c0_i32_0 = arith.constant 0 : i32
    %c0_i32_1 = arith.constant 0 : i32
    return %c0_i32, %c0_i32_0 : i32, i32
  }
  func.func @transform_5(%arg0: i32) -> (i32, i32, i32) {
    %c0_i32 = arith.constant 0 : i32
    %c0_i32_0 = arith.constant 0 : i32
    %c0_i32_1 = arith.constant 0 : i32
    return %arg0, %c0_i32, %c0_i32_0 : i32, i32, i32
  }
  func.func @transform_6(%arg0: i32) -> (i32, i32) {
    %c0_i32 = arith.constant 0 : i32
    %c0_i32_0 = arith.constant 0 : i32
    %c0_i32_1 = arith.constant 0 : i32
    return %c0_i32, %c0_i32_0 : i32, i32
  }
}

module attributes {stable_mosaic.version = 11 : i64} {
  func.func @_conv1d_bn_stats_kernel(%arg0: i32, %arg1: memref<1x16x8xf32, #tpu.memory_space<vmem>>, %arg2: memref<24x16xf32, #tpu.memory_space<vmem>>, %arg3: memref<1x16xf32, #tpu.memory_space<vmem>>, %arg4: memref<1x8x16xf32, #tpu.memory_space<vmem>>, %arg5: memref<2x16xf32, #tpu.memory_space<vmem>>, %arg6: memref<25x8xf32, #tpu.memory_space<vmem>>) attributes {dimension_semantics = [#tpu.dimension_semantics<arbitrary>], iteration_bounds = array<i64: 2>, scalar_prefetch = 0 : i64, scratch_operands = 1 : i64, tpu.core_type = #tpu.core_type<tc>, window_params = [{transform_indices = @transform_0, window_bounds = array<i64: 1, 16, 8>}, {pipeline_mode = #tpu.pipeline_mode<synchronous>, transform_indices = @transform_1, window_bounds = array<i64: 24, 16>}, {pipeline_mode = #tpu.pipeline_mode<synchronous>, transform_indices = @transform_2, window_bounds = array<i64: 1, 16>}, {transform_indices = @transform_3, window_bounds = array<i64: 1, 8, 16>}, {pipeline_mode = #tpu.pipeline_mode<synchronous>, transform_indices = @transform_4, window_bounds = array<i64: 2, 16>}]} {
    %c0 = arith.constant 0 : index
    %c0_0 = arith.constant 0 : index
    %c0_1 = arith.constant 0 : index
    %0 = vector.load %arg1[%c0, %c0_0, %c0_1] : memref<1x16x8xf32, #tpu.memory_space<vmem>>, vector<1x16x8xf32>
    %1 = vector.shape_cast %0 : vector<1x16x8xf32> to vector<16x8xf32>
    %c8 = arith.constant 8 : index
    %c0_2 = arith.constant 0 : index
    %2 = vector.load %arg6[%c8, %c0_2] : memref<25x8xf32, #tpu.memory_space<vmem>>, vector<16x8xf32>
    tpu.vector_store %arg6[%c8, %c0_2], %1 {strides = array<i32>} : memref<25x8xf32, #tpu.memory_space<vmem>>, vector<16x8xf32>,
    %c9 = arith.constant 9 : index
    %c0_3 = arith.constant 0 : index
    %3 = vector.load %arg6[%c9, %c0_3] : memref<25x8xf32, #tpu.memory_space<vmem>>, vector<1x8xf32>
    %c7 = arith.constant 7 : index
    %c0_4 = arith.constant 0 : index
    %4 = vector.load %arg6[%c7, %c0_4] : memref<25x8xf32, #tpu.memory_space<vmem>>, vector<1x8xf32>
    tpu.vector_store %arg6[%c7, %c0_4], %3 {strides = array<i32>} : memref<25x8xf32, #tpu.memory_space<vmem>>, vector<1x8xf32>,
    %c22 = arith.constant 22 : index
    %c0_5 = arith.constant 0 : index
    %5 = vector.load %arg6[%c22, %c0_5] : memref<25x8xf32, #tpu.memory_space<vmem>>, vector<1x8xf32>
    %c24 = arith.constant 24 : index
    %c0_6 = arith.constant 0 : index
    %6 = vector.load %arg6[%c24, %c0_6] : memref<25x8xf32, #tpu.memory_space<vmem>>, vector<1x8xf32>
    tpu.vector_store %arg6[%c24, %c0_6], %5 {strides = array<i32>} : memref<25x8xf32, #tpu.memory_space<vmem>>, vector<1x8xf32>,
    %c7_7 = arith.constant 7 : index
    %c0_8 = arith.constant 0 : index
    %7 = tpu.strided_load %arg6[%c7_7, %c0_8] {strides = array<i32: 2, 1>} : memref<25x8xf32, #tpu.memory_space<vmem>>, vector<8x8xf32>
    %c8_9 = arith.constant 8 : index
    %c0_10 = arith.constant 0 : index
    %8 = tpu.strided_load %arg6[%c8_9, %c0_10] {strides = array<i32: 2, 1>} : memref<25x8xf32, #tpu.memory_space<vmem>>, vector<8x8xf32>
    %c9_11 = arith.constant 9 : index
    %c0_12 = arith.constant 0 : index
    %9 = tpu.strided_load %arg6[%c9_11, %c0_12] {strides = array<i32: 2, 1>} : memref<25x8xf32, #tpu.memory_space<vmem>>, vector<8x8xf32>
    %10 = tpu.concatenate %7, %8, %9 in 1 : vector<8x8xf32>, vector<8x8xf32>, vector<8x8xf32> -> vector<8x24xf32>
    %11 = arith.truncf %10 : vector<8x24xf32> to vector<8x24xbf16>
    %c0_13 = arith.constant 0 : index
    %c0_14 = arith.constant 0 : index
    %12 = vector.load %arg2[%c0_13, %c0_14] : memref<24x16xf32, #tpu.memory_space<vmem>>, vector<24x16xf32>
    %13 = arith.truncf %12 : vector<24x16xf32> to vector<24x16xbf16>
    %cst = arith.constant dense<0.000000e+00> : vector<8x16xf32>
    %14 = tpu.matmul %11, %13, %cst {dimension_numbers = #tpu.dot_dimension_numbers<[1], [0], [0], [1], [0, 0, 1, 1], [], []>} : vector<8x24xbf16>, vector<24x16xbf16>, vector<8x16xf32> -> vector<8x16xf32>
    %c0_15 = arith.constant 0 : index
    %c0_16 = arith.constant 0 : index
    %15 = vector.load %arg3[%c0_15, %c0_16] : memref<1x16xf32, #tpu.memory_space<vmem>>, vector<1x16xf32>
    %16 = vector.broadcast %15 : vector<1x16xf32> to vector<8x16xf32>
    %17 = arith.addf %14, %16 : vector<8x16xf32>
    %c0_17 = arith.constant 0 : index
    %c0_18 = arith.constant 0 : index
    %c0_19 = arith.constant 0 : index
    %18 = vector.load %arg4[%c0_17, %c0_18, %c0_19] : memref<1x8x16xf32, #tpu.memory_space<vmem>>, vector<1x8x16xf32>
    %19 = vector.shape_cast %18 : vector<1x8x16xf32> to vector<8x16xf32>
    %20 = vector.shape_cast %17 : vector<8x16xf32> to vector<1x8x16xf32>
    tpu.vector_store %arg4[%c0_17, %c0_18, %c0_19], %20 {strides = array<i32>} : memref<1x8x16xf32, #tpu.memory_space<vmem>>, vector<1x8x16xf32>,
    %c0_i32 = arith.constant 0 : i32
    %21 = arith.cmpi eq, %arg0, %c0_i32 : i32
    %22 = arith.extui %21 : i1 to i32
    %c0_i32_20 = arith.constant 0 : i32
    %23 = arith.cmpi ne, %22, %c0_i32_20 : i32
    scf.if %23 {
      %cst_27 = arith.constant 0.000000e+00 : f32
      %33 = vector.broadcast %cst_27 : f32 to vector<2x16xf32>
      %c0_28 = arith.constant 0 : index
      %c0_29 = arith.constant 0 : index
      %34 = vector.load %arg5[%c0_28, %c0_29] : memref<2x16xf32, #tpu.memory_space<vmem>>, vector<2x16xf32>
      tpu.vector_store %arg5[%c0_28, %c0_29], %33 {strides = array<i32>} : memref<2x16xf32, #tpu.memory_space<vmem>>, vector<2x16xf32>,
    } else {
    }
    %c0_21 = arith.constant 0 : index
    %c0_22 = arith.constant 0 : index
    %24 = vector.load %arg5[%c0_21, %c0_22] : memref<2x16xf32, #tpu.memory_space<vmem>>, vector<2x16xf32>
    %cst_23 = arith.constant dense<0.000000e+00> : vector<16xf32>
    %25 = vector.multi_reduction <add>, %17, %cst_23 [0] : vector<8x16xf32> to vector<16xf32>
    %26 = vector.shape_cast %25 : vector<16xf32> to vector<1x16xf32>
    %27 = arith.mulf %17, %17 : vector<8x16xf32>
    %cst_24 = arith.constant dense<0.000000e+00> : vector<16xf32>
    %28 = vector.multi_reduction <add>, %27, %cst_24 [0] : vector<8x16xf32> to vector<16xf32>
    %29 = vector.shape_cast %28 : vector<16xf32> to vector<1x16xf32>
    %30 = tpu.concatenate %26, %29 in 0 : vector<1x16xf32>, vector<1x16xf32> -> vector<2x16xf32>
    %31 = arith.addf %24, %30 : vector<2x16xf32>
    %c0_25 = arith.constant 0 : index
    %c0_26 = arith.constant 0 : index
    %32 = vector.load %arg5[%c0_25, %c0_26] : memref<2x16xf32, #tpu.memory_space<vmem>>, vector<2x16xf32>
    tpu.vector_store %arg5[%c0_25, %c0_26], %31 {strides = array<i32>} : memref<2x16xf32, #tpu.memory_space<vmem>>, vector<2x16xf32>,
    return
  }
  func.func @transform_0(%arg0: i32) -> (i32, i32, i32) {
    %c0_i32 = arith.constant 0 : i32
    %c0_i32_0 = arith.constant 0 : i32
    %c0_i32_1 = arith.constant 0 : i32
    return %arg0, %c0_i32, %c0_i32_0 : i32, i32, i32
  }
  func.func @transform_1(%arg0: i32) -> (i32, i32) {
    %c0_i32 = arith.constant 0 : i32
    %c0_i32_0 = arith.constant 0 : i32
    %c0_i32_1 = arith.constant 0 : i32
    return %c0_i32, %c0_i32_0 : i32, i32
  }
  func.func @transform_2(%arg0: i32) -> (i32, i32) {
    %c0_i32 = arith.constant 0 : i32
    %c0_i32_0 = arith.constant 0 : i32
    %c0_i32_1 = arith.constant 0 : i32
    return %c0_i32, %c0_i32_0 : i32, i32
  }
  func.func @transform_3(%arg0: i32) -> (i32, i32, i32) {
    %c0_i32 = arith.constant 0 : i32
    %c0_i32_0 = arith.constant 0 : i32
    %c0_i32_1 = arith.constant 0 : i32
    return %arg0, %c0_i32, %c0_i32_0 : i32, i32, i32
  }
  func.func @transform_4(%arg0: i32) -> (i32, i32) {
    %c0_i32 = arith.constant 0 : i32
    %c0_i32_0 = arith.constant 0 : i32
    %c0_i32_1 = arith.constant 0 : i32
    return %c0_i32, %c0_i32_0 : i32, i32
  }
}

module attributes {stable_mosaic.version = 11 : i64} {
  func.func @_se_residual_swish_kernel(%arg0: i32, %arg1: memref<1x8x16xf32, #tpu.memory_space<vmem>>, %arg2: memref<1x16xf32, #tpu.memory_space<vmem>>, %arg3: memref<1x16xf32, #tpu.memory_space<vmem>>, %arg4: memref<16x8xf32, #tpu.memory_space<vmem>>, %arg5: memref<1x8xf32, #tpu.memory_space<vmem>>, %arg6: memref<8x16xf32, #tpu.memory_space<vmem>>, %arg7: memref<1x16xf32, #tpu.memory_space<vmem>>, %arg8: memref<1x8x16xf32, #tpu.memory_space<vmem>>, %arg9: memref<1x16xf32, #tpu.memory_space<vmem>>, %arg10: memref<1x16xf32, #tpu.memory_space<vmem>>, %arg11: memref<1x8x16xf32, #tpu.memory_space<vmem>>) attributes {dimension_semantics = [#tpu.dimension_semantics<parallel>], iteration_bounds = array<i64: 2>, scalar_prefetch = 0 : i64, scratch_operands = 0 : i64, tpu.core_type = #tpu.core_type<tc>, window_params = [{transform_indices = @transform_0, window_bounds = array<i64: 1, 8, 16>}, {pipeline_mode = #tpu.pipeline_mode<synchronous>, transform_indices = @transform_1, window_bounds = array<i64: 1, 16>}, {pipeline_mode = #tpu.pipeline_mode<synchronous>, transform_indices = @transform_2, window_bounds = array<i64: 1, 16>}, {pipeline_mode = #tpu.pipeline_mode<synchronous>, transform_indices = @transform_3, window_bounds = array<i64: 16, 8>}, {pipeline_mode = #tpu.pipeline_mode<synchronous>, transform_indices = @transform_4, window_bounds = array<i64: 1, 8>}, {pipeline_mode = #tpu.pipeline_mode<synchronous>, transform_indices = @transform_5, window_bounds = array<i64: 8, 16>}, {pipeline_mode = #tpu.pipeline_mode<synchronous>, transform_indices = @transform_6, window_bounds = array<i64: 1, 16>}, {transform_indices = @transform_7, window_bounds = array<i64: 1, 8, 16>}, {pipeline_mode = #tpu.pipeline_mode<synchronous>, transform_indices = @transform_8, window_bounds = array<i64: 1, 16>}, {pipeline_mode = #tpu.pipeline_mode<synchronous>, transform_indices = @transform_9, window_bounds = array<i64: 1, 16>}, {transform_indices = @transform_10, window_bounds = array<i64: 1, 8, 16>}]} {
    %c0 = arith.constant 0 : index
    %c0_0 = arith.constant 0 : index
    %c0_1 = arith.constant 0 : index
    %0 = vector.load %arg1[%c0, %c0_0, %c0_1] : memref<1x8x16xf32, #tpu.memory_space<vmem>>, vector<1x8x16xf32>
    %1 = vector.shape_cast %0 : vector<1x8x16xf32> to vector<8x16xf32>
    %c0_2 = arith.constant 0 : index
    %c0_3 = arith.constant 0 : index
    %2 = vector.load %arg2[%c0_2, %c0_3] : memref<1x16xf32, #tpu.memory_space<vmem>>, vector<1x16xf32>
    %3 = vector.broadcast %2 : vector<1x16xf32> to vector<8x16xf32>
    %4 = arith.mulf %1, %3 : vector<8x16xf32>
    %c0_4 = arith.constant 0 : index
    %c0_5 = arith.constant 0 : index
    %5 = vector.load %arg3[%c0_4, %c0_5] : memref<1x16xf32, #tpu.memory_space<vmem>>, vector<1x16xf32>
    %6 = vector.broadcast %5 : vector<1x16xf32> to vector<8x16xf32>
    %7 = arith.addf %4, %6 : vector<8x16xf32>
    %8 = arith.negf %7 : vector<8x16xf32>
    %9 = math.exp %8 : vector<8x16xf32>
    %cst = arith.constant 1.000000e+00 : f32
    %10 = vector.broadcast %cst : f32 to vector<8x16xf32>
    %11 = arith.addf %10, %9 : vector<8x16xf32>
    %12 = arith.divf %10, %11 : vector<8x16xf32>
    %cst_6 = arith.constant dense<0.000000e+00> : vector<16xf32>
    %13 = vector.multi_reduction <add>, %12, %cst_6 [0] : vector<8x16xf32> to vector<16xf32>
    %14 = vector.shape_cast %13 : vector<16xf32> to vector<1x16xf32>
    %cst_7 = arith.constant 8.000000e+00 : f32
    %15 = vector.broadcast %cst_7 : f32 to vector<1x16xf32>
    %16 = arith.divf %14, %15 : vector<1x16xf32>
    %c0_8 = arith.constant 0 : index
    %c0_9 = arith.constant 0 : index
    %17 = vector.load %arg4[%c0_8, %c0_9] : memref<16x8xf32, #tpu.memory_space<vmem>>, vector<16x8xf32>
    %cst_10 = arith.constant dense<0.000000e+00> : vector<1x8xf32>
    %18 = tpu.matmul %16, %17, %cst_10 {dimension_numbers = #tpu.dot_dimension_numbers<[1], [0], [0], [1], [0, 0, 1, 1], [], []>} : vector<1x16xf32>, vector<16x8xf32>, vector<1x8xf32> -> vector<1x8xf32>
    %c0_11 = arith.constant 0 : index
    %c0_12 = arith.constant 0 : index
    %19 = vector.load %arg5[%c0_11, %c0_12] : memref<1x8xf32, #tpu.memory_space<vmem>>, vector<1x8xf32>
    %20 = arith.addf %18, %19 : vector<1x8xf32>
    %21 = arith.negf %20 : vector<1x8xf32>
    %22 = math.exp %21 : vector<1x8xf32>
    %cst_13 = arith.constant 1.000000e+00 : f32
    %23 = vector.broadcast %cst_13 : f32 to vector<1x8xf32>
    %24 = arith.addf %23, %22 : vector<1x8xf32>
    %25 = arith.divf %23, %24 : vector<1x8xf32>
    %c0_14 = arith.constant 0 : index
    %c0_15 = arith.constant 0 : index
    %26 = vector.load %arg6[%c0_14, %c0_15] : memref<8x16xf32, #tpu.memory_space<vmem>>, vector<8x16xf32>
    %cst_16 = arith.constant dense<0.000000e+00> : vector<1x16xf32>
    %27 = tpu.matmul %25, %26, %cst_16 {dimension_numbers = #tpu.dot_dimension_numbers<[1], [0], [0], [1], [0, 0, 1, 1], [], []>} : vector<1x8xf32>, vector<8x16xf32>, vector<1x16xf32> -> vector<1x16xf32>
    %c0_17 = arith.constant 0 : index
    %c0_18 = arith.constant 0 : index
    %28 = vector.load %arg7[%c0_17, %c0_18] : memref<1x16xf32, #tpu.memory_space<vmem>>, vector<1x16xf32>
    %29 = arith.addf %27, %28 : vector<1x16xf32>
    %30 = arith.negf %29 : vector<1x16xf32>
    %31 = math.exp %30 : vector<1x16xf32>
    %cst_19 = arith.constant 1.000000e+00 : f32
    %32 = vector.broadcast %cst_19 : f32 to vector<1x16xf32>
    %33 = arith.addf %32, %31 : vector<1x16xf32>
    %34 = arith.divf %32, %33 : vector<1x16xf32>
    %35 = vector.broadcast %34 : vector<1x16xf32> to vector<8x16xf32>
    %36 = arith.mulf %12, %35 : vector<8x16xf32>
    %c0_20 = arith.constant 0 : index
    %c0_21 = arith.constant 0 : index
    %c0_22 = arith.constant 0 : index
    %37 = vector.load %arg8[%c0_20, %c0_21, %c0_22] : memref<1x8x16xf32, #tpu.memory_space<vmem>>, vector<1x8x16xf32>
    %38 = vector.shape_cast %37 : vector<1x8x16xf32> to vector<8x16xf32>
    %c0_23 = arith.constant 0 : index
    %c0_24 = arith.constant 0 : index
    %39 = vector.load %arg9[%c0_23, %c0_24] : memref<1x16xf32, #tpu.memory_space<vmem>>, vector<1x16xf32>
    %40 = vector.broadcast %39 : vector<1x16xf32> to vector<8x16xf32>
    %41 = arith.mulf %38, %40 : vector<8x16xf32>
    %c0_25 = arith.constant 0 : index
    %c0_26 = arith.constant 0 : index
    %42 = vector.load %arg10[%c0_25, %c0_26] : memref<1x16xf32, #tpu.memory_space<vmem>>, vector<1x16xf32>
    %43 = vector.broadcast %42 : vector<1x16xf32> to vector<8x16xf32>
    %44 = arith.addf %41, %43 : vector<8x16xf32>
    %45 = arith.addf %36, %44 : vector<8x16xf32>
    %cst_27 = arith.constant 1.000000e+00 : f32
    %46 = vector.broadcast %cst_27 : f32 to vector<8x16xf32>
    %47 = arith.mulf %46, %45 : vector<8x16xf32>
    %48 = arith.negf %47 : vector<8x16xf32>
    %49 = math.exp %48 : vector<8x16xf32>
    %cst_28 = arith.constant 1.000000e+00 : f32
    %50 = vector.broadcast %cst_28 : f32 to vector<8x16xf32>
    %51 = arith.addf %50, %49 : vector<8x16xf32>
    %52 = arith.divf %50, %51 : vector<8x16xf32>
    %53 = arith.mulf %45, %52 : vector<8x16xf32>
    %c0_29 = arith.constant 0 : index
    %c0_30 = arith.constant 0 : index
    %c0_31 = arith.constant 0 : index
    %54 = vector.load %arg11[%c0_29, %c0_30, %c0_31] : memref<1x8x16xf32, #tpu.memory_space<vmem>>, vector<1x8x16xf32>
    %55 = vector.shape_cast %54 : vector<1x8x16xf32> to vector<8x16xf32>
    %56 = vector.shape_cast %53 : vector<8x16xf32> to vector<1x8x16xf32>
    tpu.vector_store %arg11[%c0_29, %c0_30, %c0_31], %56 {strides = array<i32>} : memref<1x8x16xf32, #tpu.memory_space<vmem>>, vector<1x8x16xf32>,
    return
  }
  func.func @transform_0(%arg0: i32) -> (i32, i32, i32) {
    %c0_i32 = arith.constant 0 : i32
    %c0_i32_0 = arith.constant 0 : i32
    %c0_i32_1 = arith.constant 0 : i32
    return %arg0, %c0_i32, %c0_i32_0 : i32, i32, i32
  }
  func.func @transform_1(%arg0: i32) -> (i32, i32) {
    %c0_i32 = arith.constant 0 : i32
    %c0_i32_0 = arith.constant 0 : i32
    %c0_i32_1 = arith.constant 0 : i32
    return %c0_i32, %c0_i32_0 : i32, i32
  }
  func.func @transform_2(%arg0: i32) -> (i32, i32) {
    %c0_i32 = arith.constant 0 : i32
    %c0_i32_0 = arith.constant 0 : i32
    %c0_i32_1 = arith.constant 0 : i32
    return %c0_i32, %c0_i32_0 : i32, i32
  }
  func.func @transform_3(%arg0: i32) -> (i32, i32) {
    %c0_i32 = arith.constant 0 : i32
    %c0_i32_0 = arith.constant 0 : i32
    %c0_i32_1 = arith.constant 0 : i32
    return %c0_i32, %c0_i32_0 : i32, i32
  }
  func.func @transform_4(%arg0: i32) -> (i32, i32) {
    %c0_i32 = arith.constant 0 : i32
    %c0_i32_0 = arith.constant 0 : i32
    %c0_i32_1 = arith.constant 0 : i32
    return %c0_i32, %c0_i32_0 : i32, i32
  }
  func.func @transform_5(%arg0: i32) -> (i32, i32) {
    %c0_i32 = arith.constant 0 : i32
    %c0_i32_0 = arith.constant 0 : i32
    %c0_i32_1 = arith.constant 0 : i32
    return %c0_i32, %c0_i32_0 : i32, i32
  }
  func.func @transform_6(%arg0: i32) -> (i32, i32) {
    %c0_i32 = arith.constant 0 : i32
    %c0_i32_0 = arith.constant 0 : i32
    %c0_i32_1 = arith.constant 0 : i32
    return %c0_i32, %c0_i32_0 : i32, i32
  }
  func.func @transform_7(%arg0: i32) -> (i32, i32, i32) {
    %c0_i32 = arith.constant 0 : i32
    %c0_i32_0 = arith.constant 0 : i32
    %c0_i32_1 = arith.constant 0 : i32
    return %arg0, %c0_i32, %c0_i32_0 : i32, i32, i32
  }
  func.func @transform_8(%arg0: i32) -> (i32, i32) {
    %c0_i32 = arith.constant 0 : i32
    %c0_i32_0 = arith.constant 0 : i32
    %c0_i32_1 = arith.constant 0 : i32
    return %c0_i32, %c0_i32_0 : i32, i32
  }
  func.func @transform_9(%arg0: i32) -> (i32, i32) {
    %c0_i32 = arith.constant 0 : i32
    %c0_i32_0 = arith.constant 0 : i32
    %c0_i32_1 = arith.constant 0 : i32
    return %c0_i32, %c0_i32_0 : i32, i32
  }
  func.func @transform_10(%arg0: i32) -> (i32, i32, i32) {
    %c0_i32 = arith.constant 0 : i32
    %c0_i32_0 = arith.constant 0 : i32
    %c0_i32_1 = arith.constant 0 : i32
    return %arg0, %c0_i32, %c0_i32_0 : i32, i32, i32
  }
}

</mosaic_0001>

<bundles_post_ra>
// kernel: mul.46
= control target key start
LH: loop header
LB: loop body
LE: loop exit
PB: predicated region body
PF: predicated region fallthrough
CT: control target
= control target key end

     0   :  { %s34_s0 = inlined_call_operand.vmem [shape: f32[1,16], index: 0, kind: input, shape index: {}]   ;;  %s35_s1 = inlined_call_operand.vmem [shape: f32[1,16], index: 1, kind: input, shape index: {}]   ;;  %s36_s2 = inlined_call_operand.vmem [shape: f32[1,16], index: 2, kind: output, shape index: {}]  }
   0x1   :  { %v3_v0 = vld [vmem:[%s34_s0] sm:$0x1] }
   0x2   :  { %v4_v1 = vld [vmem:[%s35_s1] sm:$0x1] }
   0x3   :  { %v7_v2 = vmul.f32 %v4_v1, %v3_v0 }
   0x5   :  { %9 = vst [vmem:[%s36_s2] sm:$0x1] %v7_v2 }

// kernel: contextnet_block.6
= control target key start
LH: loop header
LB: loop body
LE: loop exit
PB: predicated region body
PF: predicated region fallthrough
CT: control target
= control target key end

     0   :  { %s535_s21 = smov 0   ;;  %s594_s0 = inlined_call_operand.vmem [shape: f32[2,16,8], index: 0, kind: input, shape index: {}]   ;;  %s595_s1 = inlined_call_operand.vmem [shape: f32[3,8], index: 1, kind: input, shape index: {}]   ;;  %s596_s2 = inlined_call_operand.vmem [shape: f32[1,8], index: 2, kind: input, shape index: {}]   ;;  %s597_s3 = inlined_call_operand.vmem [shape: f32[8,16], index: 3, kind: input, shape index: {}]   ;;  %s598_s4 = inlined_call_operand.vmem [shape: f32[1,16], index: 4, kind: input, shape index: {}]   ;;  %s599_s5 = inlined_call_operand.vmem [shape: f32[2,16,16], index: 5, kind: output, shape index: {0}]   ;;  %s600_s6 = inlined_call_operand.vmem [shape: f32[2,16], index: 6, kind: output, shape index: {1}]  }
   0x1 LB: > { %s541_s22 = sadd.s32 4294967295, %s495_s21   ;;  %p457_p0 = scmp.ge.s32.totalorder %s495_s21, 1  ;;  %s495_s21 = sphi %s535_s21, %s17_s21  }
   0x2   : > { %p210_p1 = scmp.lt.s32.totalorder %s495_s21, 3 }
   0x4   : > { %p211_p2 = pnand %p457_p0, %p210_p1 }
   0x5   : > { %v300_v0 = vld [vmem:[%s597_s3] sm:$0xff] (!%p211_p2)  ;;  %vm312_vm0 = vcmask (!%p211_p2), 1043456   ;;  %p240_p3 = scmp.lt.s32.totalorder (!%p211_p2), %s541_s22, 1  ;;  %v497_v1 = vmov (!%p211_p2), 0.0   ;;  %vm498_vm1 = vmmov (!%p211_p2), 0   ;;  %v264_v3 = vlaneseq (!%p211_p2)  ;;  %p465_p4 = scmp.ne.s32.totalorder (!%p211_p2), %s541_s22, 0 }
   0x6   : > { %214 = sbr.rel (%p211_p2) target bundleno = 282 (0x11a), region = 40  ;;  %472 = vmatprep.subr.bf16.mxu0 (!%p211_p2), %v497_v1  ;;  %v301_v2 = vpack.c.bf16 (!%p211_p2), %v300_v0, %v300_v0  ;;  %474 = vmatprep.mubr.msk.bf16.mxu0 (!%p211_p2), %vm498_vm1, %v497_v1  ;;  %vm253_vm2 = vcmask (!%p211_p2), 64512   ;;  %v261_v10 = vld [vmem:[%s595_s1] sm:$0x7] (!%p211_p2)  ;;  %vm257_vm3 = vcmask (!%p211_p2), 57344   ;;  %vm357_vm4 = vcmask (!%p211_p2), 130048  }
   0x7   : > { %v265_v5 = vshrl.u32 (!%p211_p2), %v264_v3, 7  ;;  %v462_v30 = vld [vmem:[%s596_s2] ss:$0 sm:$0xff] (!%p211_p2) }
   0x8   : > { %v314_v4 = vsel (!%p211_p2), %vm312_vm0, %v301_v2, 0  ;;  %v463_v37 = vld [vmem:[%s598_s4] ss:$0 sm:$0xff] (!%p211_p2) }
   0x9   : > { %473 = vmatpush3.bf16.msra.mxu0 (!%p211_p2), %v314_v4  ;;  %v266_v8 = vsub.s32 (!%p211_p2), 0, %v265_v5  ;;  %v274_v9 = vsub.s32 (!%p211_p2), 1, %v265_v5  ;;  %v284_v17 = vsub.s32 (!%p211_p2), 2, %v265_v5 }
   0xb   : > { %v267_v11 = vrot.slane (!%p211_p2), %v261_v10, %v266_v8  ;;  %v275_v12 = vrot.slane (!%p211_p2), %v261_v10, %v274_v9  ;;  %v285_v21 = vrot.slane (!%p211_p2), %v261_v10, %v284_v17 }
   0xd   : > { %s550_s25 = scalar_select %p240_p3, %s541_s22, 1 }
   0xe   : > { %vm364_vm5 = vcmask (!%p465_p4), 123904   ;;  %v499_v44 = vmov (!%p465_p4), 0.0  }
   0xf   : > { %s468_s26 = sshll.u32 %s550_s25, 4  ;;  %365 = vst.msk [vmem:[%s600_s6] sm:$0x3] (!%p465_p4), %vm364_vm5, %v499_v44 }
  0x10   : > { %s244_s29 = scalar_lea.vmem %s594_s0, %s468_s26  ;;  %s249_s14 = scalar_lea.vmem %s599_s5, %s468_s26 }
  0x11   : > { %v251_v6 = vld [vmem:[%s244_s29] sm:$0xff]  ;;  %v252_v7 = vld [vmem:[%s244_s29 + $0x8] sm:$0xff] }
  0x12   : > { %254 = vst.msk [vmem:[#allocation2 + $0x8] sm:$0xff] %vm253_vm2, %v251_v6  ;;  %255 = vst.msk [vmem:[#allocation2 + $0x10] sm:$0xff] %vm253_vm2, %v252_v7 }
  0x19   : > { %v256_v13 = vld [vmem:[#allocation2 + $0x9] sm:$0x1]  ;;  %v259_v14 = vld [vmem:[#allocation2 + $0x16] sm:$0x1] }
  0x1a   : > { %v263_v15 = vld [vmem:[#allocation2 + $0xf] sm:$0xff]  ;;  %258 = vst.msk [vmem:[#allocation2 + $0x7] sm:$0x1] %vm257_vm3, %v256_v13  ;;  %260 = vst.msk [vmem:[#allocation2 + $0x18] sm:$0x1] %vm257_vm3, %v259_v14 }
  0x1b   : > { %v271_v16 = vld [vmem:[#allocation2 + $0x10] sm:$0xff]  ;;  %v269_v18 = vmul.f32 %v267_v11, %v263_v15  ;;  %v270_v20 = vld [vmem:[#allocation2 + $0x8] sm:$0xff] }
  0x1c   : > { %v277_v19 = vmul.f32 %v275_v12, %v271_v16  ;;  %v280_v22 = vld [vmem:[#allocation2 + $0x9] sm:$0xff]  ;;  %v276_v23 = vmul.f32 %v275_v12, %v270_v20 }
  0x1d   : > { %v286_v28 = vmul.f32 %v285_v21, %v280_v22 }
  0x1e   : > { %v279_v24 = vadd.f32 %v277_v19, %v269_v18 }
  0x21   : > { %v262_v25 = vld [vmem:[#allocation2 + $0x7] sm:$0xff]  ;;  %v281_v26 = vld [vmem:[#allocation2 + $0x11] sm:$0xff] }
  0x22   : > { %v268_v27 = vmul.f32 %v267_v11, %v262_v25  ;;  %v287_v29 = vmul.f32 %v285_v21, %v281_v26 }
  0x24   : > { %v278_v31 = vadd.f32 %v276_v23, %v268_v27  ;;  %v289_v32 = vadd.f32 %v287_v29, %v279_v24 }
  0x26   : > { %v288_v33 = vadd.f32 %v286_v28, %v278_v31  ;;  %v298_v34 = vadd.f32 %v462_v30, %v289_v32 }
  0x28   : > { %v297_v35 = vadd.f32 %v462_v30, %v288_v33 }
  0x2a   : > { %v299_v36 = vpack.c.bf16 %v298_v34, %v297_v35 }
  0x2c   : > { %475 = vmatmul.mubr.msk.bf16.vlgmr.msra.gmra.mrb[0].mxu0 %vm253_vm2, %v299_v36 }
  0xfe   : > { %363 = sbr.rel (%p465_p4) target bundleno = 261 (0x105), region = 44 }
  0xff   : > { %v350_v38 = vpop.f32.mrb[0].mxu0 }
 0x100   : > { %v351_v39 = vadd.f32 %v463_v37, %v350_v38  ;;  %v476_v40 = vpop.f32.mrb[1].mxu0 }
 0x101   : > { %v353_v41 = vpop.f32.mrb[2].mxu0 }
 0x102   : > { %358 = vst.msk [vmem:[%s249_s14] sm:$0xff] %vm357_vm4, %v351_v39  ;;  %v354_v42 = vadd.f32 %v463_v37, %v353_v41  ;;  %v477_v43 = vpop.f32.mrb[3].mxu0 }
 0x104   : > { %359 = vst.msk [vmem:[%s249_s14 + $0x8] sm:$0xff] %vm357_vm4, %v354_v42 }
 0x105 PF: > { %v367_v45 = vsel %vm357_vm4, %v351_v39, 0.0  ;;  %v368_v46 = vsel %vm357_vm4, %v354_v42, 0.0  ;;  %v376_v47 = vmul.f32 %v351_v39, %v351_v39  ;;  %v377_v48 = vmul.f32 %v354_v42, %v354_v42  ;;  %v366_v0 = vld [vmem:[%s600_s6] sm:$0x3] }
 0x106   : > { %v369_v49 = vadd.f32 %v368_v46, %v367_v45  ;;  %vm387_vm6 = vcmask 1040384   ;;  %vm390_vm7 = vcmask 123904  }
 0x107   : > { %v378_v50 = vsel %vm357_vm4, %v376_v47, 0.0  ;;  %v379_v51 = vsel %vm357_vm4, %v377_v48, 0.0 }
 0x108   : > { %v370_v52 = vrot.slane %v369_v49, 4  ;;  %v380_v53 = vadd.f32 %v379_v51, %v378_v50 }
 0x10a   : > { %v371_v54 = vadd.f32 %v370_v52, %v369_v49  ;;  %v381_v55 = vrot.slane %v380_v53, 4 }
 0x10c   : > { %v372_v56 = vrot.slane %v371_v54, 2  ;;  %v382_v57 = vadd.f32 %v381_v55, %v380_v53 }
 0x10e   : > { %v373_v58 = vadd.f32 %v372_v56, %v371_v54  ;;  %v383_v59 = vrot.slane %v382_v57, 2 }
 0x110   : > { %v374_v60 = vrot.slane %v373_v58, 1  ;;  %v384_v61 = vadd.f32 %v383_v59, %v382_v57 }
 0x112   : > { %v375_v62 = vadd.f32 %v374_v60, %v373_v58  ;;  %v385_v63 = vrot.slane %v384_v61, 1 }
 0x114   : > { %v386_v1 = vadd.f32 %v385_v63, %v384_v61 }
 0x116   : > { %v388_v2 = vsel %vm387_vm6, %v375_v62, %v386_v1 }
 0x117   : > { %v389_v3 = vadd.f32 %v388_v2, %v366_v0 }
 0x119   : > { %391 = vst.msk [vmem:[%s600_s6] sm:$0x3] %vm390_vm7, %v389_v3 }
 0x11a PF: > { %s17_s21 = sadd.s32 1, %s495_s21  }
 0x11b   : > { %p14_p5 = scmp.ge.s32.totalorder %s17_s21, 4  }
 0x11d   :  { %16 = sbr.rel (!%p14_p5) target bundleno = 1 (0x1), region = 82 }

// kernel: contextnet_block.8
= control target key start
LH: loop header
LB: loop body
LE: loop exit
PB: predicated region body
PF: predicated region fallthrough
CT: control target
= control target key end

     0   :  { %s512_s21 = smov 0   ;;  %s568_s0 = inlined_call_operand.vmem [shape: f32[2,16,16], index: 0, kind: input, shape index: {}]   ;;  %s569_s1 = inlined_call_operand.vmem [shape: f32[3,16], index: 1, kind: input, shape index: {}]   ;;  %s570_s2 = inlined_call_operand.vmem [shape: f32[1,16], index: 2, kind: input, shape index: {}]   ;;  %s571_s3 = inlined_call_operand.vmem [shape: f32[16,16], index: 3, kind: input, shape index: {}]   ;;  %s572_s4 = inlined_call_operand.vmem [shape: f32[1,16], index: 4, kind: input, shape index: {}]   ;;  %s573_s5 = inlined_call_operand.vmem [shape: f32[2,8,16], index: 5, kind: output, shape index: {0}]   ;;  %s574_s6 = inlined_call_operand.vmem [shape: f32[2,16], index: 6, kind: output, shape index: {1}]  }
   0x1 LB: > { %s518_s22 = sadd.s32 4294967295, %s472_s21   ;;  %p436_p0 = scmp.ge.s32.totalorder %s472_s21, 1  ;;  %s472_s21 = sphi %s512_s21, %s17_s21  }
   0x2   : > { %p210_p1 = scmp.lt.s32.totalorder %s472_s21, 3 }
   0x4   : > { %p211_p2 = pnand %p436_p0, %p210_p1 }
   0x5   : > { %v292_v0 = vld [vmem:[%s571_s3] sm:$0xff] (!%p211_p2)  ;;  %v293_v1 = vld [vmem:[%s571_s3 + $0x8] sm:$0xff] (!%p211_p2)  ;;  %p239_p3 = scmp.lt.s32.totalorder (!%p211_p2), %s518_s22, 1  ;;  %v474_v2 = vmov (!%p211_p2), 0.0   ;;  %vm475_vm0 = vmmov (!%p211_p2), 0   ;;  %vm251_vm1 = vcmask (!%p211_p2), 130048   ;;  %v262_v4 = vlaneseq (!%p211_p2) }
   0x6   : > { %214 = sbr.rel (%p211_p2) target bundleno = 278 (0x116), region = 40  ;;  %449 = vmatprep.subr.bf16.mxu0 (!%p211_p2), %v474_v2  ;;  %v294_v3 = vpack.c.bf16 (!%p211_p2), %v293_v1, %v292_v0  ;;  %451 = vmatprep.mubr.msk.bf16.mxu0 (!%p211_p2), %vm475_vm0, %v474_v2  ;;  %vm255_vm2 = vcmask (!%p211_p2), 122880   ;;  %v259_v10 = vld [vmem:[%s569_s1] sm:$0x7] (!%p211_p2)  ;;  %p443_p4 = scmp.ne.s32.totalorder (!%p211_p2), %s518_s22, 0 }
   0x7   : > { %v263_v7 = vshrl.u32 (!%p211_p2), %v262_v4, 7  ;;  %v440_v23 = vld [vmem:[%s570_s2] ss:$0 sm:$0xff] (!%p211_p2) }
   0x8   : > { %450 = vmatpush3.bf16.msra.mxu0 (!%p211_p2), %v294_v3  ;;  %v441_v27 = vld [vmem:[%s572_s4] ss:$0 sm:$0xff] (!%p211_p2) }
   0x9   : > { %v271_v8 = vsub.s32 (!%p211_p2), 1, %v263_v7  ;;  %v264_v11 = vsub.s32 (!%p211_p2), 0, %v263_v7  ;;  %v279_v12 = vsub.s32 (!%p211_p2), 2, %v263_v7 }
   0xb   : > { %v272_v13 = vrot.slane (!%p211_p2), %v259_v10, %v271_v8  ;;  %v265_v15 = vrot.slane (!%p211_p2), %v259_v10, %v264_v11  ;;  %v280_v16 = vrot.slane (!%p211_p2), %v259_v10, %v279_v12 }
   0xd   : > { %s530_s27 = scalar_select %p239_p3, %s518_s22, 1 }
   0xe   : > { %vm350_vm3 = vcmask (!%p443_p4), 123904   ;;  %v476_v33 = vmov (!%p443_p4), 0.0  }
   0xf   : > { %s446_s28 = sshll.u32 %s530_s27, 4  ;;  %s439_s12 = sshll.u32 %s530_s27, 3  ;;  %351 = vst.msk [vmem:[%s574_s6] sm:$0x3] (!%p443_p4), %vm350_vm3, %v476_v33 }
  0x10   : > { %s243_s7 = scalar_lea.vmem %s568_s0, %s446_s28  ;;  %s247_s17 = scalar_lea.vmem %s573_s5, %s439_s12 }
  0x11   : > { %v249_v5 = vld [vmem:[%s243_s7] sm:$0xff]  ;;  %v250_v6 = vld [vmem:[%s243_s7 + $0x8] sm:$0xff] }
  0x12   : > { %252 = vst.msk [vmem:[#allocation2 + $0x8] sm:$0xff] %vm251_vm1, %v249_v5  ;;  %253 = vst.msk [vmem:[#allocation2 + $0x10] sm:$0xff] %vm251_vm1, %v250_v6 }
  0x19   : > { %v254_v9 = vld [vmem:[#allocation2 + $0x9] sm:$0x1]  ;;  %v268_v14 = vld [vmem:[#allocation2 + $0x8] ss:$2 sm:$0xff] }
  0x1a   : > { %256 = vst.msk [vmem:[#allocation2 + $0x7] sm:$0x1] %vm255_vm2, %v254_v9  ;;  %v276_v17 = vld [vmem:[#allocation2 + $0x9] ss:$2 sm:$0xff]  ;;  %v273_v18 = vmul.f32 %v272_v13, %v268_v14 }
  0x1b   : > { %v281_v21 = vmul.f32 %v280_v16, %v276_v17 }
  0x21   : > { %v261_v19 = vld [vmem:[#allocation2 + $0x7] ss:$2 sm:$0xff] }
  0x22   : > { %v266_v20 = vmul.f32 %v265_v15, %v261_v19 }
  0x24   : > { %v274_v22 = vadd.f32 %v273_v18, %v266_v20 }
  0x26   : > { %v282_v24 = vadd.f32 %v281_v21, %v274_v22 }
  0x28   : > { %v290_v25 = vadd.f32 %v440_v23, %v282_v24 }
  0x2a   : > { %v291_v26 = vpack.c.bf16 %v290_v25, %v290_v25 }
  0x2c   : > { %452 = vmatmul.mubr.msk.bf16.vlgmr.msra.gmra.mrb[0].mxu0 %vm251_vm1, %v291_v26 }
  0xfc   : > { %349 = sbr.rel (%p443_p4) target bundleno = 259 (0x103), region = 44 }
  0xff   : > { %v339_v28 = vpop.f32.mrb[0].mxu0 }
 0x100   : > { %v340_v29 = vadd.f32 %v441_v27, %v339_v28  ;;  %v453_v30 = vpop.f32.mrb[1].mxu0 }
 0x101   : > { %v342_v31 = vpop.f32.mrb[2].mxu0 }
 0x102   : > { %345 = vst.msk [vmem:[%s247_s17] sm:$0xff] %vm251_vm1, %v340_v29  ;;  %v454_v32 = vpop.f32.mrb[3].mxu0 }
 0x103 PF: > { %v353_v34 = vsel %vm251_vm1, %v340_v29, 0.0  ;;  %v360_v35 = vmul.f32 %v340_v29, %v340_v29  ;;  %vm368_vm4 = vcmask 1040384   ;;  %v352_v48 = vld [vmem:[%s574_s6] sm:$0x3]  ;;  %vm371_vm5 = vcmask 123904  }
 0x104   : > { %v354_v36 = vrot.slane %v353_v34, 4 }
 0x105   : > { %v361_v37 = vsel %vm251_vm1, %v360_v35, 0.0 }
 0x106   : > { %v355_v38 = vadd.f32 %v354_v36, %v353_v34  ;;  %v362_v39 = vrot.slane %v361_v37, 4 }
 0x108   : > { %v356_v40 = vrot.slane %v355_v38, 2  ;;  %v363_v41 = vadd.f32 %v362_v39, %v361_v37 }
 0x10a   : > { %v357_v42 = vadd.f32 %v356_v40, %v355_v38  ;;  %v364_v43 = vrot.slane %v363_v41, 2 }
 0x10c   : > { %v358_v44 = vrot.slane %v357_v42, 1  ;;  %v365_v45 = vadd.f32 %v364_v43, %v363_v41 }
 0x10e   : > { %v359_v46 = vadd.f32 %v358_v44, %v357_v42  ;;  %v366_v47 = vrot.slane %v365_v45, 1 }
 0x110   : > { %v367_v49 = vadd.f32 %v366_v47, %v365_v45 }
 0x112   : > { %v369_v50 = vsel %vm368_vm4, %v359_v46, %v367_v49 }
 0x113   : > { %v370_v51 = vadd.f32 %v369_v50, %v352_v48 }
 0x115   : > { %372 = vst.msk [vmem:[%s574_s6] sm:$0x3] %vm371_vm5, %v370_v51 }
 0x116 PF: > { %s17_s21 = sadd.s32 1, %s472_s21  }
 0x117   : > { %p14_p5 = scmp.ge.s32.totalorder %s17_s21, 4  }
 0x119   :  { %16 = sbr.rel (!%p14_p5) target bundleno = 1 (0x1), region = 85 }

// kernel: contextnet_block.9
= control target key start
LH: loop header
LB: loop body
LE: loop exit
PB: predicated region body
PF: predicated region fallthrough
CT: control target
= control target key end

     0   :  { %s484_s21 = smov 0   ;;  %s534_s0 = inlined_call_operand.vmem [shape: f32[2,8,16], index: 0, kind: input, shape index: {}]   ;;  %s535_s1 = inlined_call_operand.vmem [shape: f32[1,16], index: 1, kind: input, shape index: {}]   ;;  %s536_s2 = inlined_call_operand.vmem [shape: f32[1,16], index: 2, kind: input, shape index: {}]   ;;  %s537_s3 = inlined_call_operand.vmem [shape: f32[16,16], index: 3, kind: input, shape index: {}]   ;;  %s538_s4 = inlined_call_operand.vmem [shape: f32[1,16], index: 4, kind: input, shape index: {}]   ;;  %s539_s5 = inlined_call_operand.vmem [shape: f32[2,8,16], index: 5, kind: output, shape index: {0}]   ;;  %s540_s6 = inlined_call_operand.vmem [shape: f32[2,16], index: 6, kind: output, shape index: {1}]  }
   0x1 LB: > { %s490_s22 = sadd.s32 4294967295, %s444_s21   ;;  %p409_p0 = scmp.ge.s32.totalorder %s444_s21, 1  ;;  %s444_s21 = sphi %s484_s21, %s17_s21  }
   0x2   : > { %p209_p1 = scmp.lt.s32.totalorder %s444_s21, 3 }
   0x4   : > { %p210_p2 = pnand %p409_p0, %p209_p1 }
   0x5   : > { %v264_v0 = vld [vmem:[%s537_s3] sm:$0xff] (!%p210_p2)  ;;  %v265_v1 = vld [vmem:[%s537_s3 + $0x8] sm:$0xff] (!%p210_p2)  ;;  %p237_p3 = scmp.lt.s32.totalorder (!%p210_p2), %s490_s22, 1  ;;  %v446_v2 = vmov (!%p210_p2), 0.0   ;;  %vm447_vm0 = vmmov (!%p210_p2), 0   ;;  %vm274_vm1 = vcmask (!%p210_p2), 130048  }
   0x6   : > { %213 = sbr.rel (%p210_p2) target bundleno = 258 (0x102), region = 40  ;;  %421 = vmatprep.subr.bf16.mxu0 (!%p210_p2), %v446_v2  ;;  %v266_v3 = vpack.c.bf16 (!%p210_p2), %v265_v1, %v264_v0  ;;  %423 = vmatprep.mubr.msk.bf16.mxu0 (!%p210_p2), %vm447_vm0, %v446_v2  ;;  %v412_v4 = vld [vmem:[%s535_s1] ss:$0 sm:$0xff] (!%p210_p2)  ;;  %p416_p4 = scmp.ne.s32.totalorder (!%p210_p2), %s490_s22, 0 }
   0x7   : > { %v413_v6 = vld [vmem:[%s536_s2] ss:$0 sm:$0xff] (!%p210_p2) }
   0x8   : > { %422 = vmatpush3.bf16.msra.mxu0 (!%p210_p2), %v266_v3  ;;  %v414_v10 = vld [vmem:[%s538_s4] ss:$0 sm:$0xff] (!%p210_p2) }
   0xd   : > { %s238_s27 = scalar_select %p237_p3, %s490_s22, 1 }
   0xe   : > { %vm323_vm2 = vcmask (!%p416_p4), 123904   ;;  %v448_v16 = vmov (!%p416_p4), 0.0  }
   0xf   : > { %s410_s28 = sshll.u32 %s238_s27, 3  ;;  %324 = vst.msk [vmem:[%s540_s6] sm:$0x3] (!%p416_p4), %vm323_vm2, %v448_v16 }
  0x10   : > { %s240_s9 = scalar_lea.vmem %s534_s0, %s410_s28  ;;  %s244_s16 = scalar_lea.vmem %s539_s5, %s410_s28 }
  0x11   : > { %v247_v5 = vld [vmem:[%s240_s9] sm:$0xff] }
  0x12   : > { %v254_v7 = vmul.f32 %v412_v4, %v247_v5 }
  0x14   : > { %v262_v8 = vadd.f32 %v413_v6, %v254_v7 }
  0x16   : > { %v263_v9 = vpack.c.bf16 %v262_v8, %v262_v8 }
  0x18   : > { %424 = vmatmul.mubr.msk.bf16.vlgmr.msra.gmra.mrb[0].mxu0 %vm274_vm1, %v263_v9 }
  0xe8   : > { %322 = sbr.rel (%p416_p4) target bundleno = 239 (0xef), region = 44 }
  0xeb   : > { %v312_v11 = vpop.f32.mrb[0].mxu0 }
  0xec   : > { %v313_v12 = vadd.f32 %v414_v10, %v312_v11  ;;  %v425_v13 = vpop.f32.mrb[1].mxu0 }
  0xed   : > { %v315_v14 = vpop.f32.mrb[2].mxu0 }
  0xee   : > { %318 = vst.msk [vmem:[%s244_s16] sm:$0xff] %vm274_vm1, %v313_v12  ;;  %v426_v15 = vpop.f32.mrb[3].mxu0 }
  0xef PF: > { %v326_v17 = vsel %vm274_vm1, %v313_v12, 0.0  ;;  %v333_v18 = vmul.f32 %v313_v12, %v313_v12  ;;  %vm341_vm3 = vcmask 1040384   ;;  %v325_v31 = vld [vmem:[%s540_s6] sm:$0x3]  ;;  %vm344_vm4 = vcmask 123904  }
  0xf0   : > { %v327_v19 = vrot.slane %v326_v17, 4 }
  0xf1   : > { %v334_v20 = vsel %vm274_vm1, %v333_v18, 0.0 }
  0xf2   : > { %v328_v21 = vadd.f32 %v327_v19, %v326_v17  ;;  %v335_v22 = vrot.slane %v334_v20, 4 }
  0xf4   : > { %v329_v23 = vrot.slane %v328_v21, 2  ;;  %v336_v24 = vadd.f32 %v335_v22, %v334_v20 }
  0xf6   : > { %v330_v25 = vadd.f32 %v329_v23, %v328_v21  ;;  %v337_v26 = vrot.slane %v336_v24, 2 }
  0xf8   : > { %v331_v27 = vrot.slane %v330_v25, 1  ;;  %v338_v28 = vadd.f32 %v337_v26, %v336_v24 }
  0xfa   : > { %v332_v29 = vadd.f32 %v331_v27, %v330_v25  ;;  %v339_v30 = vrot.slane %v338_v28, 1 }
  0xfc   : > { %v340_v32 = vadd.f32 %v339_v30, %v338_v28 }
  0xfe   : > { %v342_v33 = vsel %vm341_vm3, %v332_v29, %v340_v32 }
  0xff   : > { %v343_v34 = vadd.f32 %v342_v33, %v325_v31 }
 0x101   : > { %345 = vst.msk [vmem:[%s540_s6] sm:$0x3] %vm344_vm4, %v343_v34 }
 0x102 PF: > { %s17_s21 = sadd.s32 1, %s444_s21  }
 0x103   : > { %p14_p5 = scmp.ge.s32.totalorder %s17_s21, 4  }
 0x105   :  { %16 = sbr.rel (!%p14_p5) target bundleno = 1 (0x1), region = 82 }

// kernel: contextnet_block.7
= control target key start
LH: loop header
LB: loop body
LE: loop exit
PB: predicated region body
PF: predicated region fallthrough
CT: control target
= control target key end

     0   :  { %s531_s21 = smov 0   ;;  %s593_s0 = inlined_call_operand.vmem [shape: f32[2,16,16], index: 0, kind: input, shape index: {}]   ;;  %s594_s1 = inlined_call_operand.vmem [shape: f32[3,16], index: 1, kind: input, shape index: {}]   ;;  %s595_s2 = inlined_call_operand.vmem [shape: f32[1,16], index: 2, kind: input, shape index: {}]   ;;  %s596_s3 = inlined_call_operand.vmem [shape: f32[16,16], index: 3, kind: input, shape index: {}]   ;;  %s597_s4 = inlined_call_operand.vmem [shape: f32[1,16], index: 4, kind: input, shape index: {}]   ;;  %s598_s5 = inlined_call_operand.vmem [shape: f32[2,16,16], index: 5, kind: output, shape index: {0}]   ;;  %s599_s6 = inlined_call_operand.vmem [shape: f32[2,16], index: 6, kind: output, shape index: {1}]  }
   0x1 LB: > { %s537_s22 = sadd.s32 4294967295, %s491_s21   ;;  %p453_p0 = scmp.ge.s32.totalorder %s491_s21, 1  ;;  %s491_s21 = sphi %s531_s21, %s17_s21  }
   0x2   : > { %p210_p1 = scmp.lt.s32.totalorder %s491_s21, 3 }
   0x4   : > { %p211_p2 = pnand %p453_p0, %p210_p1 }
   0x5   : > { %v300_v0 = vld [vmem:[%s596_s3] sm:$0xff] (!%p211_p2)  ;;  %v301_v1 = vld [vmem:[%s596_s3 + $0x8] sm:$0xff] (!%p211_p2)  ;;  %p240_p3 = scmp.lt.s32.totalorder (!%p211_p2), %s537_s22, 1  ;;  %v493_v2 = vmov (!%p211_p2), 0.0   ;;  %vm494_vm0 = vmmov (!%p211_p2), 0   ;;  %v264_v4 = vlaneseq (!%p211_p2)  ;;  %vm253_vm1 = vcmask (!%p211_p2), 130048  }
   0x6   : > { %214 = sbr.rel (%p211_p2) target bundleno = 282 (0x11a), region = 40  ;;  %468 = vmatprep.subr.bf16.mxu0 (!%p211_p2), %v493_v2  ;;  %v302_v3 = vpack.c.bf16 (!%p211_p2), %v301_v1, %v300_v0  ;;  %470 = vmatprep.mubr.msk.bf16.mxu0 (!%p211_p2), %vm494_vm0, %v493_v2  ;;  %v261_v10 = vld [vmem:[%s594_s1] sm:$0x7] (!%p211_p2)  ;;  %vm257_vm2 = vcmask (!%p211_p2), 122880   ;;  %p461_p4 = scmp.ne.s32.totalorder (!%p211_p2), %s537_s22, 0 }
   0x7   : > { %v265_v5 = vshrl.u32 (!%p211_p2), %v264_v4, 7  ;;  %v458_v30 = vld [vmem:[%s595_s2] ss:$0 sm:$0xff] (!%p211_p2) }
   0x8   : > { %469 = vmatpush3.bf16.msra.mxu0 (!%p211_p2), %v302_v3  ;;  %v459_v37 = vld [vmem:[%s597_s4] ss:$0 sm:$0xff] (!%p211_p2) }
   0x9   : > { %v266_v8 = vsub.s32 (!%p211_p2), 0, %v265_v5  ;;  %v274_v9 = vsub.s32 (!%p211_p2), 1, %v265_v5  ;;  %v284_v17 = vsub.s32 (!%p211_p2), 2, %v265_v5 }
   0xb   : > { %v267_v11 = vrot.slane (!%p211_p2), %v261_v10, %v266_v8  ;;  %v275_v12 = vrot.slane (!%p211_p2), %v261_v10, %v274_v9  ;;  %v285_v21 = vrot.slane (!%p211_p2), %v261_v10, %v284_v17 }
   0xd   : > { %s549_s27 = scalar_select %p240_p3, %s537_s22, 1 }
   0xe   : > { %vm360_vm3 = vcmask (!%p461_p4), 123904   ;;  %v495_v44 = vmov (!%p461_p4), 0.0  }
   0xf   : > { %s464_s28 = sshll.u32 %s549_s27, 4  ;;  %361 = vst.msk [vmem:[%s599_s6] sm:$0x3] (!%p461_p4), %vm360_vm3, %v495_v44 }
  0x10   : > { %s244_s7 = scalar_lea.vmem %s593_s0, %s464_s28  ;;  %s249_s16 = scalar_lea.vmem %s598_s5, %s464_s28 }
  0x11   : > { %v251_v6 = vld [vmem:[%s244_s7] sm:$0xff]  ;;  %v252_v7 = vld [vmem:[%s244_s7 + $0x8] sm:$0xff] }
  0x12   : > { %254 = vst.msk [vmem:[#allocation2 + $0x8] sm:$0xff] %vm253_vm1, %v251_v6  ;;  %255 = vst.msk [vmem:[#allocation2 + $0x10] sm:$0xff] %vm253_vm1, %v252_v7 }
  0x19   : > { %v256_v13 = vld [vmem:[#allocation2 + $0x9] sm:$0x1]  ;;  %v259_v14 = vld [vmem:[#allocation2 + $0x16] sm:$0x1] }
  0x1a   : > { %v263_v15 = vld [vmem:[#allocation2 + $0xf] sm:$0xff]  ;;  %258 = vst.msk [vmem:[#allocation2 + $0x7] sm:$0x1] %vm257_vm2, %v256_v13  ;;  %260 = vst.msk [vmem:[#allocation2 + $0x18] sm:$0x1] %vm257_vm2, %v259_v14 }
  0x1b   : > { %v271_v16 = vld [vmem:[#allocation2 + $0x10] sm:$0xff]  ;;  %v269_v18 = vmul.f32 %v267_v11, %v263_v15  ;;  %v270_v20 = vld [vmem:[#allocation2 + $0x8] sm:$0xff] }
  0x1c   : > { %v277_v19 = vmul.f32 %v275_v12, %v271_v16  ;;  %v280_v22 = vld [vmem:[#allocation2 + $0x9] sm:$0xff]  ;;  %v276_v23 = vmul.f32 %v275_v12, %v270_v20 }
  0x1d   : > { %v286_v28 = vmul.f32 %v285_v21, %v280_v22 }
  0x1e   : > { %v279_v24 = vadd.f32 %v277_v19, %v269_v18 }
  0x21   : > { %v262_v25 = vld [vmem:[#allocation2 + $0x7] sm:$0xff]  ;;  %v281_v26 = vld [vmem:[#allocation2 + $0x11] sm:$0xff] }
  0x22   : > { %v268_v27 = vmul.f32 %v267_v11, %v262_v25  ;;  %v287_v29 = vmul.f32 %v285_v21, %v281_v26 }
  0x24   : > { %v278_v31 = vadd.f32 %v276_v23, %v268_v27  ;;  %v289_v32 = vadd.f32 %v287_v29, %v279_v24 }
  0x26   : > { %v288_v33 = vadd.f32 %v286_v28, %v278_v31  ;;  %v298_v34 = vadd.f32 %v458_v30, %v289_v32 }
  0x28   : > { %v297_v35 = vadd.f32 %v458_v30, %v288_v33 }
  0x2a   : > { %v299_v36 = vpack.c.bf16 %v298_v34, %v297_v35 }
  0x2c   : > { %471 = vmatmul.mubr.msk.bf16.vlgmr.msra.gmra.mrb[0].mxu0 %vm253_vm1, %v299_v36 }
  0xfe   : > { %359 = sbr.rel (%p461_p4) target bundleno = 261 (0x105), region = 44 }
  0xff   : > { %v347_v38 = vpop.f32.mrb[0].mxu0 }
 0x100   : > { %v348_v39 = vadd.f32 %v459_v37, %v347_v38  ;;  %v472_v40 = vpop.f32.mrb[1].mxu0 }
 0x101   : > { %v350_v41 = vpop.f32.mrb[2].mxu0 }
 0x102   : > { %354 = vst.msk [vmem:[%s249_s16] sm:$0xff] %vm253_vm1, %v348_v39  ;;  %v351_v42 = vadd.f32 %v459_v37, %v350_v41  ;;  %v473_v43 = vpop.f32.mrb[3].mxu0 }
 0x104   : > { %355 = vst.msk [vmem:[%s249_s16 + $0x8] sm:$0xff] %vm253_vm1, %v351_v42 }
 0x105 PF: > { %v363_v45 = vsel %vm253_vm1, %v348_v39, 0.0  ;;  %v364_v46 = vsel %vm253_vm1, %v351_v42, 0.0  ;;  %v372_v47 = vmul.f32 %v348_v39, %v348_v39  ;;  %v373_v48 = vmul.f32 %v351_v42, %v351_v42  ;;  %v362_v0 = vld [vmem:[%s599_s6] sm:$0x3] }
 0x106   : > { %v365_v49 = vadd.f32 %v364_v46, %v363_v45  ;;  %vm383_vm4 = vcmask 1040384   ;;  %vm386_vm5 = vcmask 123904  }
 0x107   : > { %v374_v50 = vsel %vm253_vm1, %v372_v47, 0.0  ;;  %v375_v51 = vsel %vm253_vm1, %v373_v48, 0.0 }
 0x108   : > { %v366_v52 = vrot.slane %v365_v49, 4  ;;  %v376_v53 = vadd.f32 %v375_v51, %v374_v50 }
 0x10a   : > { %v367_v54 = vadd.f32 %v366_v52, %v365_v49  ;;  %v377_v55 = vrot.slane %v376_v53, 4 }
 0x10c   : > { %v368_v56 = vrot.slane %v367_v54, 2  ;;  %v378_v57 = vadd.f32 %v377_v55, %v376_v53 }
 0x10e   : > { %v369_v58 = vadd.f32 %v368_v56, %v367_v54  ;;  %v379_v59 = vrot.slane %v378_v57, 2 }
 0x110   : > { %v370_v60 = vrot.slane %v369_v58, 1  ;;  %v380_v61 = vadd.f32 %v379_v59, %v378_v57 }
 0x112   : > { %v371_v62 = vadd.f32 %v370_v60, %v369_v58  ;;  %v381_v63 = vrot.slane %v380_v61, 1 }
 0x114   : > { %v382_v1 = vadd.f32 %v381_v63, %v380_v61 }
 0x116   : > { %v384_v2 = vsel %vm383_vm4, %v371_v62, %v382_v1 }
 0x117   : > { %v385_v3 = vadd.f32 %v384_v2, %v362_v0 }
 0x119   : > { %387 = vst.msk [vmem:[%s599_s6] sm:$0x3] %vm386_vm5, %v385_v3 }
 0x11a PF: > { %s17_s21 = sadd.s32 1, %s491_s21  }
 0x11b   : > { %p14_p5 = scmp.ge.s32.totalorder %s17_s21, 4  }
 0x11d   :  { %16 = sbr.rel (!%p14_p5) target bundleno = 1 (0x1), region = 82 }

// kernel: contextnet_block.10
= control target key start
LH: loop header
LB: loop body
LE: loop exit
PB: predicated region body
PF: predicated region fallthrough
CT: control target
= control target key end

     0   :  { %s446_s15 = smov 0   ;;  %s500_s0 = inlined_call_operand.vmem [shape: f32[2,16,8], index: 0, kind: input, shape index: {}]   ;;  %s501_s1 = inlined_call_operand.vmem [shape: f32[24,16], index: 1, kind: input, shape index: {}]   ;;  %s502_s2 = inlined_call_operand.vmem [shape: f32[1,16], index: 2, kind: input, shape index: {}]   ;;  %s503_s3 = inlined_call_operand.vmem [shape: f32[2,8,16], index: 3, kind: output, shape index: {0}]   ;;  %s504_s4 = inlined_call_operand.vmem [shape: f32[2,16], index: 4, kind: output, shape index: {1}]  }
   0x1 LB: > { %s452_s16 = sadd.s32 4294967295, %s414_s15   ;;  %p374_p0 = scmp.ge.s32.totalorder %s414_s15, 1  ;;  %s414_s15 = sphi %s446_s15, %s15_s15  }
   0x2   : > { %p160_p1 = scmp.lt.s32.totalorder %s414_s15, 3 }
   0x4   : > { %p161_p2 = pnand %p374_p0, %p160_p1 }
   0x5   : > { %p185_p3 = scmp.lt.s32.totalorder (!%p161_p2), %s452_s16, 1  ;;  %v223_v0 = vld [vmem:[%s501_s1] sm:$0xff] (!%p161_p2)  ;;  %v416_v1 = vmov (!%p161_p2), 0.0   ;;  %v224_v2 = vld [vmem:[%s501_s1 + $0x8] sm:$0xff] (!%p161_p2)  ;;  %v225_v4 = vld [vmem:[%s501_s1 + $0x10] sm:$0xff] (!%p161_p2)  ;;  %vm197_vm0 = vcmask (!%p161_p2), 64512  }
   0x6   : > { %164 = sbr.rel (%p161_p2) target bundleno = 382 (0x17e), region = 32  ;;  %387 = vmatprep.subr.bf16.mxu0 (!%p161_p2), %v416_v1  ;;  %v226_v3 = vpack.c.bf16 (!%p161_p2), %v224_v2, %v223_v0  ;;  %v227_v5 = vpack.c.bf16 (!%p161_p2), %v225_v4, %v225_v4  ;;  %vm239_vm1 = vcmask (!%p161_p2), 1043456   ;;  %vm417_vm2 = vmmov (!%p161_p2), 0   ;;  %s418_s28 = smov (!%p161_p2), 8   ;;  %v378_v18 = vld [vmem:[%s502_s2] ss:$0 sm:$0xff] (!%p161_p2) }
   0x7   : > { %391 = vmatprep.mubr.msk.bf16.mxu0 (!%p161_p2), %vm417_vm2, %v416_v1  ;;  %vm201_vm3 = vcmask (!%p161_p2), 57344   ;;  %s419_s29 = smov (!%p161_p2), 16   ;;  %vm220_vm4 = vcmask (!%p161_p2), 130048   ;;  %vm235_vm5 = vcmask (!%p161_p2), 195584   ;;  %p380_p4 = scmp.ne.s32.totalorder (!%p161_p2), %s452_s16, 0 }
   0x8   : > { %388 = vmatpush3.bf16.msra.mxu0 (!%p161_p2), %v226_v3  ;;  %v241_v6 = vsel (!%p161_p2), %vm239_vm1, %v227_v5, 0 }
   0x9   : > { %389 = vmatprep.subr.bf16.mxu0 (!%p161_p2), %v416_v1 }
   0xc   : > { %390 = vmatpush3.bf16.msra.mxu0 (!%p161_p2), %v241_v6 }
   0xd   : > { %s464_s21 = scalar_select %p185_p3, %s452_s16, 1 }
   0xe   : > { %vm288_vm6 = vcmask (!%p380_p4), 123904   ;;  %v420_v24 = vmov (!%p380_p4), 0.0  }
   0xf   : > { %s383_s24 = sshll.u32 %s464_s21, 4  ;;  %s377_s30 = sshll.u32 %s464_s21, 3  ;;  %289 = vst.msk [vmem:[%s504_s4] sm:$0x3] (!%p380_p4), %vm288_vm6, %v420_v24 }
  0x10   : > { %s189_s27 = scalar_lea.vmem %s500_s0, %s383_s24  ;;  %s193_s9 = scalar_lea.vmem %s503_s3, %s377_s30 }
  0x11   : > { %v195_v7 = vld [vmem:[%s189_s27] sm:$0xff]  ;;  %v196_v8 = vld [vmem:[%s189_s27 + $0x8] sm:$0xff] }
  0x12   : > { %198 = vst.msk [vmem:[#allocation2 + $0x8] sm:$0xff] %vm197_vm0, %v195_v7  ;;  %199 = vst.msk [vmem:[#allocation2 + $0x10] sm:$0xff] %vm197_vm0, %v196_v8 }
  0x19   : > { %v208_v9 = vld [vmem:[#allocation2 + $0x8] ss:$2 sm:$0xff]  ;;  %v200_v10 = vld [vmem:[#allocation2 + $0x9] sm:$0x1] }
  0x1a   : > { %212 = vrot.lane.b32.xlu0 %v208_v9, %s418_s28  ;;  %v210_v11 = vld [vmem:[#allocation2 + $0x9] ss:$2 sm:$0xff]  ;;  %202 = vst.msk [vmem:[#allocation2 + $0x7] sm:$0x1] %vm201_vm3, %v200_v10 }
  0x1e   : > { %216 = vrot.lane.b32.xlu0 %v210_v11, %s419_s29 }
  0x21   : > { %v206_v13 = vld [vmem:[#allocation2 + $0x7] ss:$2 sm:$0xff] }
  0x8c   : > { %v213_v12 = vpop.permute.xlu0 %212 }
  0x8d   : > { %v219_v14 = vsel %vm197_vm0, %v206_v13, %v213_v12 }
  0x90   : > { %v217_v15 = vpop.permute.xlu0 %216 }
  0x91   : > { %v221_v16 = vsel %vm220_vm4, %v219_v14, %v217_v15 }
  0x92   : > { %v222_v17 = vpack.c.bf16 %v221_v16, %v221_v16 }
  0x94   : > { %392 = vmatmul.mubr.msk.bf16.vlgmr.msra.gmra.mrb[0].mxu0 %vm235_vm5, %v222_v17 }
 0x164   : > { %287 = sbr.rel (%p380_p4) target bundleno = 363 (0x16b), region = 36 }
 0x167   : > { %v277_v19 = vpop.f32.mrb[0].mxu0 }
 0x168   : > { %v278_v20 = vadd.f32 %v378_v18, %v277_v19  ;;  %v393_v21 = vpop.f32.mrb[1].mxu0 }
 0x169   : > { %v280_v22 = vpop.f32.mrb[2].mxu0 }
 0x16a   : > { %283 = vst.msk [vmem:[%s193_s9] sm:$0xff] %vm220_vm4, %v278_v20  ;;  %v394_v23 = vpop.f32.mrb[3].mxu0 }
 0x16b PF: > { %v291_v25 = vsel %vm220_vm4, %v278_v20, 0.0  ;;  %v298_v26 = vmul.f32 %v278_v20, %v278_v20  ;;  %vm306_vm7 = vcmask 1040384   ;;  %v290_v39 = vld [vmem:[%s504_s4] sm:$0x3]  ;;  %vm309_vm8 = vcmask 123904  }
 0x16c   : > { %v292_v27 = vrot.slane %v291_v25, 4 }
 0x16d   : > { %v299_v28 = vsel %vm220_vm4, %v298_v26, 0.0 }
 0x16e   : > { %v293_v29 = vadd.f32 %v292_v27, %v291_v25  ;;  %v300_v30 = vrot.slane %v299_v28, 4 }
 0x170   : > { %v294_v31 = vrot.slane %v293_v29, 2  ;;  %v301_v32 = vadd.f32 %v300_v30, %v299_v28 }
 0x172   : > { %v295_v33 = vadd.f32 %v294_v31, %v293_v29  ;;  %v302_v34 = vrot.slane %v301_v32, 2 }
 0x174   : > { %v296_v35 = vrot.slane %v295_v33, 1  ;;  %v303_v36 = vadd.f32 %v302_v34, %v301_v32 }
 0x176   : > { %v297_v37 = vadd.f32 %v296_v35, %v295_v33  ;;  %v304_v38 = vrot.slane %v303_v36, 1 }
 0x178   : > { %v305_v40 = vadd.f32 %v304_v38, %v303_v36 }
 0x17a   : > { %v307_v41 = vsel %vm306_vm7, %v297_v37, %v305_v40 }
 0x17b   : > { %v308_v42 = vadd.f32 %v307_v41, %v290_v39 }
 0x17d   : > { %310 = vst.msk [vmem:[%s504_s4] sm:$0x3] %vm309_vm8, %v308_v42 }
 0x17e PF: > { %s15_s15 = sadd.s32 1, %s414_s15  }
 0x17f   : > { %p12_p5 = scmp.ge.s32.totalorder %s15_s15, 4  }
 0x181   :  { %14 = sbr.rel (!%p12_p5) target bundleno = 1 (0x1), region = 77 }

// kernel: contextnet_block.11
= control target key start
LH: loop header
LB: loop body
LE: loop exit
PB: predicated region body
PF: predicated region fallthrough
CT: control target
= control target key end

     0   :  { %15 = vsyncpa [#allocation3], 0  ;;  %s1047_s0 = inlined_call_operand.vmem [shape: f32[2,8,16], index: 0, kind: input, shape index: {}]   ;;  %s1048_s1 = inlined_call_operand.vmem [shape: f32[1,16], index: 1, kind: input, shape index: {}]   ;;  %s1049_s2 = inlined_call_operand.vmem [shape: f32[1,16], index: 2, kind: input, shape index: {}]   ;;  %s1050_s3 = inlined_call_operand.vmem [shape: f32[16,8], index: 3, kind: input, shape index: {}]   ;;  %s1051_s4 = inlined_call_operand.vmem [shape: f32[1,8], index: 4, kind: input, shape index: {}]   ;;  %s1052_s5 = inlined_call_operand.vmem [shape: f32[8,16], index: 5, kind: input, shape index: {}]   ;;  %s1053_s6 = inlined_call_operand.vmem [shape: f32[1,16], index: 6, kind: input, shape index: {}]   ;;  %s1054_s7 = inlined_call_operand.vmem [shape: f32[2,8,16], index: 7, kind: input, shape index: {}]   ;;  %s1055_s8 = inlined_call_operand.vmem [shape: f32[1,16], index: 8, kind: input, shape index: {}]   ;;  %s1056_s9 = inlined_call_operand.vmem [shape: f32[1,16], index: 9, kind: input, shape index: {}]   ;;  %s1057_s10 = inlined_call_operand.hbm [shape: f32[2,8,16], index: 10, kind: output, shape index: {}]  }
   0x1   :  { %17 = vsyncpa [#allocation3 + $0x1], 0  ;;  %s907_s13 = smov 0   ;;  %s909_s14 = smov 0  }
   0x2   :  { %s911_s15 = smov 0   ;;  %s913_s16 = smov 0  }
   0x3 LB: > { %s928_s17 = sadd.s32 4294967295, %s846_s16   ;;  %s685_s18 = sadd.s32 4294967294, %s846_s16   ;;  %s846_s16 = sphi %s913_s16, %s1063_s16   ;;  %s842_s15 = sphi %s911_s15, %s1062_s15   ;;  %s838_s14 = sphi %s909_s14, %s1061_s14   ;;  %s834_s13 = sphi %s907_s13, %s1060_s13  }
   0x4   : > { %s932_s19 = sadd.s32 1, %s846_s16   ;;  %s250_s20 = sadd.s32 1, %s842_s15 }
   0x5   : > { %s247_s21 = ssub.s32 %s846_s16, %s932_s19  ;;  %p260_p0 = scmp.ne.s32.totalorder %s842_s15, %s838_s14 }
   0x6   : > { %p248_p1 = scmp.eq.s32.totalorder %s247_s21, 0  ;;  %p261_p2 = scmp.eq.s32.totalorder %s928_s17, 1 }
   0x7   : > { %p266_p3 = scmp.ne.s32.totalorder %s838_s14, %s834_s13  ;;  %p267_p4 = scmp.eq.s32.totalorder %s685_s18, 1 }
   0x8   : > { %s943_s22 = scalar_select %p248_p1, %s842_s15, %s250_s20  }
   0x9   : > { %p945_p5 = por %p261_p2, %p260_p0  ;;  %p949_p6 = por %p267_p4, %p266_p3 }
   0xa   : > { %p688_p7 = scmp.ge.s32.totalorder %s846_s16, 1  ;;  %p323_p8 = scmp.lt.s32.totalorder %s846_s16, 3 }
   0xc   : > { %p324_p9 = pnand %p688_p7, %p323_p8 }
   0xd   : > { %v405_v0 = vld [vmem:[%s1050_s3] sm:$0xff] (!%p324_p9)  ;;  %v406_v1 = vld [vmem:[%s1050_s3 + $0x8] sm:$0xff] (!%p324_p9)  ;;  %p364_p10 = scmp.lt.s32.totalorder (!%p324_p9), %s928_s17, 1  ;;  %v848_v2 = vmov (!%p324_p9), 0.0|0.0   ;;  %vm849_vm0 = vmmov (!%p324_p9), 0   ;;  %v850_v4 = vmov (!%p324_p9), 0.0   ;;  %v569_v38 = vlaneseq (!%p324_p9) }
   0xe   : > { %327 = sbr.rel (%p324_p9) target bundleno = 599 (0x257), region = 60  ;;  %723 = vmatprep.subr.bf16.mxu0 (!%p324_p9), %v848_v2  ;;  %v724_v3 = vpack.c.bf16 (!%p324_p9), %v406_v1, %v405_v0  ;;  %715 = vmatprep.mubr.msk.f32.mxu0 (!%p324_p9), %vm849_vm0, %v850_v4  ;;  %v692_v5 = vld [vmem:[%s1048_s1] ss:$0 sm:$0xff] (!%p324_p9)  ;;  %vm395_vm1 = vcmask (!%p324_p9), 130048   ;;  %vm489_vm2 = vcmask (!%p324_p9), 64512   ;;  %s703_s18 = sshll.u32 (!%p324_p9), %s928_s17, 7 }
   0xf   : > { %718 = vmatprep.subr.mxu1 (!%p324_p9), %v850_v4  ;;  %720 = vmatprep.mubr.msk.f32.mxu1 (!%p324_p9), %vm849_vm0, %v850_v4  ;;  %v693_v7 = vld [vmem:[%s1049_s2] ss:$0 sm:$0xff] (!%p324_p9)  ;;  %v570_v39 = vshrl.u32 (!%p324_p9), %v569_v38, 7  ;;  %s1004_s27 = scalar_lea.hbm (!%p324_p9), %s1057_s10, %s703_s18 }
  0x10   : > { %725 = vmatpush3.bf16.msra.mxu0 (!%p324_p9), %v724_v3  ;;  %v487_v22 = vld [vmem:[%s1052_s5] sm:$0xff] (!%p324_p9) }
  0x11   : > { %719 = vmatpush3.msra.mxu1 (!%p324_p9), %v487_v22  ;;  %v407_v23 = vld [vmem:[%s1051_s4] sm:$0x1] (!%p324_p9)  ;;  %v571_v42 = vsub.s32 (!%p324_p9), 0, %v570_v39 }
  0x12   : > { %v488_v31 = vld [vmem:[%s1053_s6] sm:$0x1] (!%p324_p9) }
  0x13   : > { %v699_v41 = vld [vmem:[%s1055_s8] ss:$0 sm:$0xff] (!%p324_p9) }
  0x14   : > { %v700_v44 = vld [vmem:[%s1056_s9] ss:$0 sm:$0xff] (!%p324_p9) }
  0x15   : > { %s963_s29 = scalar_select %p364_p10, %s928_s17, 1 }
  0x16   : > { %s851_s17 = smov [#allocation2]  }
  0x17   : > { %s690_s30 = sshll.u32 %s963_s29, 3  ;;  %s361_s29 = sand.u32 1, %s838_s14  }
  0x18   : > { %s367_s21 = scalar_lea.vmem %s1047_s0, %s690_s30  ;;  %s371_s26 = scalar_lea.vmem %s1054_s7, %s690_s30 }
  0x19   : > { %v372_v6 = vld [vmem:[%s367_s21] sm:$0xff]  ;;  %s689_s30 = sshll.u32 %s361_s29, 3  ;;  %s601_s28 = scalar_lea.sflag [#allocation3], %s361_s29 }
  0x1a   : > { %v380_v8 = vmul.f32 %v692_v5, %v372_v6  ;;  %v574_v40 = vld [vmem:[%s371_s26] sm:$0xff]  ;;  %s363_s20 = scalar_lea.vmem [#allocation2], %s689_s30  ;;  %s788_s12 = sshll.u32 %s851_s17, 4  ;;  %s789_s12 = int_to_ptr.vmem [resolvable:$false] %s788_s12 }
  0x1b   : > { %v582_v43 = vmul.f32 %v699_v41, %v574_v40  ;;  %s614_s21 = sshll.u32 %s363_s20, 4  ;;  %s790_s30 = scalar_lea.vmem %s789_s12, 256  ;;  %s1006_s21 = int_to_ptr.vmem [resolvable:$true] %s614_s21 }
  0x1c   : > { %v388_v9 = vadd.f32 %v693_v7, %v380_v8  ;;  %s784_s11 = scalar_lea.vmem %s1006_s21, 128  ;;  %p791_p0 = scmp.lt.s32.totalorder %s1006_s21, %s789_s12 }
  0x1d   : > { %v590_v47 = vadd.f32 %v700_v44, %v582_v43  ;;  %p785_p11 = scmp.ne.s32.totalorder %s1006_s21, %s784_s11  ;;  %p792_p1 = scmp.lt.s32.totalorder %s790_s30, %s784_s11 }
  0x1e   : > { %v694_v10 = vmul.f32 -1.442695, %v388_v9 }
  0x1f   : > { %p786_p12 = pnand %p785_p11, %p945_p5  ;;  %p793_p2 = por %p792_p1, %p791_p0 }
  0x20   : > { %768 = vpow2.f32 %v694_v10 }
  0x21   : > { %p787_p13 = pneg %p786_p12 }
  0x23   : > { %p794_p3 = pnand %p793_p2, %p787_p13 }
  0x2a   : > { %v769_v11 = vpop.eup %768 }
  0x2b   : > { %v392_v12 = vadd.f32 1.0, %v769_v11 }
  0x2d   : > { %770 = vrcp.f32 %v392_v12 }
  0x37   : > { %v771_v13 = vpop.eup %770 }
  0x38   : > { %v396_v14 = vsel %vm395_vm1, %v771_v13, 0.0 }
  0x39   : > { %v397_v15 = vrot.slane %v396_v14, 4 }
  0x3b   : > { %v398_v16 = vadd.f32 %v397_v15, %v396_v14 }
  0x3d   : > { %v399_v17 = vrot.slane %v398_v16, 2 }
  0x3f   : > { %v400_v18 = vadd.f32 %v399_v17, %v398_v16 }
  0x41   : > { %v401_v19 = vrot.slane %v400_v18, 1 }
  0x43   : > { %v402_v20 = vadd.f32 %v401_v19, %v400_v18 }
  0x45   : > { %v404_v21 = vmul.f32 0.125, %v402_v20 }
  0x47   : > { %716 = vmatmul.mubr.msk.f32.vlgmr.msra.gmra.mrb[0].mxu0 %vm395_vm1, %v404_v21 }
 0x11a   : > { %v477_v24 = vpop.f32.mrb[0].mxu0 }
 0x11b   : > { %v478_v25 = vadd.f32 %v477_v24, %v407_v23  ;;  %v717_v26 = vpop.f32.mrb[1].mxu0 }
 0x11d   : > { %v696_v27 = vmul.f32 -1.442695, %v478_v25 }
 0x11f   : > { %772 = vpow2.f32 %v696_v27 }
 0x129   : > { %v773_v28 = vpop.eup %772 }
 0x12a   : > { %v484_v29 = vadd.f32 1.0, %v773_v28 }
 0x12c   : > { %774 = vrcp.f32 %v484_v29 }
 0x136   : > { %v775_v30 = vpop.eup %774 }
 0x137   : > { %721 = vmatmul.mubr.msk.f32.vlgmr.msra.gmra.mrb[0].mxu1 %vm489_vm2, %v775_v30 }
 0x20a   : > { %v559_v32 = vpop.f32.mrb[0].mxu1 }
 0x20b   : > { %v560_v33 = vadd.f32 %v559_v32, %v488_v31  ;;  %v722_v34 = vpop.f32.mrb[1].mxu1 }
 0x20d   : > { %v698_v35 = vmul.f32 -1.442695, %v560_v33 }
 0x20f   : > { %776 = vpow2.f32 %v698_v35 }
 0x219   : > { %v777_v36 = vpop.eup %776 }
 0x21a   : > { %v566_v37 = vadd.f32 1.0, %v777_v36 }
 0x21c   : > { %778 = vrcp.f32 %v566_v37 }
 0x226   : > { %v779_v45 = vpop.eup %778 }
 0x227   : > { %v572_v46 = vrot.slane %v779_v45, %v571_v42 }
 0x229   : > { %v573_v48 = vmul.f32 %v771_v13, %v572_v46 }
 0x22b   : > { %v591_v49 = vadd.f32 %v590_v47, %v573_v48 }
 0x22d   : > { %v701_v50 = vmul.f32 -1.442695, %v591_v49 }
 0x22f   : > { %780 = vpow2.f32 %v701_v50 }
 0x239   : > { %v781_v51 = vpop.eup %780 }
 0x23a   : > { %v595_v52 = vadd.f32 1.0, %v781_v51 }
 0x23c   : > { %782 = vrcp.f32 %v595_v52 }
 0x246   : > { %v783_v53 = vpop.eup %782 }
 0x247   : > { %v598_v54 = vmul.f32 %v783_v53, %v591_v49 }
 0x249   : > { %599 = vst.msk [vmem:[%s363_s20] sm:$0xff] %vm395_vm1, %v598_v54 }
 0x24a   : > { %797 = shalt.err (!%p794_p3)
}
 0x24b   : > { %s798_s29 = scalar_lea.hbm %s1004_s27, 128  ;;  %s802_s25 = scalar_lea.hbm %s1057_s10, 256 }
 0x24c   : > { %p799_p4 = scmp.ne.s32.totalorder %s1004_s27, %s798_s29  ;;  %p803_p9 = scmp.lt.u32.totalorder %s1004_s27, %s1057_s10 }
 0x24d   : > { %p804_p10 = scmp.lt.u32.totalorder %s802_s25, %s798_s29  ;;  %p806_p12 = scmp.lt.u32.totalorder %s798_s29, %s1004_s27 }
 0x24e   : > { %p800_p7 = pnand %p799_p4, %p945_p5 }
 0x24f   : > { %p805_p11 = por %p804_p10, %p803_p9 }
 0x250   : > { %p801_p8 = pneg %p800_p7 }
 0x251   : > { %p807_p13 = por %p806_p12, %p805_p11 }
 0x253   : > { %p808_p0 = pnand %p807_p13, %p801_p8 }
 0x255   : > { %811 = shalt.err (!%p808_p0)
}
 0x256   : > { %726 = dma.vmem_to_hbm [thread:$0]  (%p945_p5), %s1006_s21, 128, %s1004_s27, %s601_s28  }
 0x257 PF: > { %p732_p1 = scmp.ge.s32.totalorder %s846_s16, 2  ;;  %s626_s11 = sand.u32 1, %s834_s13  }
 0x258   : > { %s627_s12 = scalar_lea.sflag [#allocation3], %s626_s11 }
 0x259   : > { %p729_p2 = pnand %p732_p1, %p949_p6 }
 0x25b   : > { %829 = dma.done.wait (!%p729_p2), %s627_s12, 128  }
 0x25c   : > { %831 = vsyncadd (!%p729_p2), %s627_s12, 4294967168  ;;  %p20_p3 = scmp.ge.s32.totalorder %s932_s19, 4   ;;  %s1060_s13 = smov %s838_s14 }
 0x25d   : > { %s1061_s14 = smov %s842_s15  ;;  %s1062_s15 = smov %s943_s22 }
 0x25e   : > { %s1063_s16 = smov %s932_s19  ;;  %22 = sbr.rel (!%p20_p3) target bundleno = 3 (0x3), region = 98 }
 0x265   :  { %632 = vsyncpa [#allocation3], 1 }
 0x266   :  { %634 = vsyncpa [#allocation3 + $0x1], 1 }

</bundles_post_ra>
